<compile_context>
chip_gen: v7x
topology: tpu7x:2x2x1
jax: 0.10.0
libtpu: 0.0.40
codegen_flags: <defaults>
</compile_context>

<pallas_src>
import math

import jax
import jax.numpy as jnp
from jax.experimental import pallas as pl
from jax.experimental.pallas import tpu as pltpu

# ----------------------------- model constants ------------------------------
D        = 32              # embedding_size
N_BEH    = 3               # len(args.behaviors)
N_USERS  = 12              # dataset.user_count
N_ITEMS  = 16              # dataset.item_count
NB       = 4               # batch size
S        = 4               # rows per batch element: [pos, neg, neg, pair]
L_INTER  = 5               # padded interaction-list length
LOG_REG  = 0.5
REG_W    = 1e-3

# ----------------------------- derived static sizes -------------------------
R_CROSS   = NB * (S - 1)          # 12 cross-loss rows (pos + negatives)
N_PAIR    = NB                    # 4 pairwise rows (synthetic batch: all valid)
NP        = 8                     # pairwise rows padded to a sublane multiple
RC_PAD    = 16                    # cross rows padded to a sublane multiple
NBKV      = N_BEH - 1             # non-target behaviors feeding K/V
NEG_ROWS  = L_INTER * NP          # 40 (interaction-major neg-preference rows)
KV_ROWS   = NBKV * NP             # 16
UTAB_ROWS = 16                    # user table (13 rows) padded
ITAB_ROWS = 24                    # item table (17 rows) padded

OFF_CROSS = 0
OFF_NEG   = OFF_CROSS + RC_PAD    # 16
OFF_PAIR  = OFF_NEG + NEG_ROWS    # 56
OFF_KV    = OFF_PAIR + NP         # 64
OFF_UTAB  = OFF_KV + KV_ROWS      # 80
OFF_ITAB  = OFF_UTAB + UTAB_ROWS  # 96
R_DATA    = OFF_ITAB + ITAB_ROWS  # 120

# weight-slab row offsets ([K, N] layouts, lanes padded to 64)
WOFF_RZ, WOFF_U, WOFF_GATE = 0, 64, 128
WOFF_Q, WOFF_KV, WOFF_GATT, WOFF_O = 192, 224, 256, 288
W_ROWS = 320


# ------------------------------ kernel helpers -------------------------------
def _sigmoid(x):
    return 1.0 / (1.0 + jnp.exp(-x))


def _log_sigmoid(x):
    # numerically stable, built only from ops with guaranteed Mosaic lowering
    return jnp.minimum(x, 0.0) - jnp.log(1.0 + jnp.exp(-jnp.abs(x)))


def _total(x):
    # full reduction to a [1, 1] tile (lanes first, then sublanes)
    return jnp.sum(jnp.sum(x, axis=1, keepdims=True), axis=0, keepdims=True)


# ------------------------------ Pallas kernel --------------------------------
def fused_kernel(data_ref, w_ref, b_ref, loss_ref):
    f32 = jnp.float32

    # ---------------- weights / biases (static, aligned slab slices) --------
    w_rz   = w_ref[WOFF_RZ:WOFF_RZ + 2 * D, :]                 # [64, 64] -> [R|Z]
    w_u    = w_ref[WOFF_U:WOFF_U + 2 * D, :][:, :D]            # [64, 32]
    w_gate = w_ref[WOFF_GATE:WOFF_GATE + 2 * D, :][:, :D]      # [64, 32]
    w_q    = w_ref[WOFF_Q:WOFF_Q + D, :][:, :D]                # [32, 32]
    w_kv   = w_ref[WOFF_KV:WOFF_KV + D, :]                     # [32, 64] -> [K|V]
    w_gatt = w_ref[WOFF_GATT:WOFF_GATT + D, :][:, :D]          # [32, 32]
    w_o    = w_ref[WOFF_O:WOFF_O + D, :][:, :D]                # [32, 32]

    b_all  = b_ref[...]                                        # [8, 64]
    b_rz   = b_all[0:1, :]
    b_u    = b_all[1:2, :D]
    b_gatt = b_all[2:3, :D]
    b_o    = b_all[3:4, :D]
    ln_g   = b_all[4:5, :D]
    ln_b   = b_all[5:6, :D]
    b_gate = b_all[6:7, :D]

    # ---------------- agg_info over cross ++ neg-preference rows ------------
    # u_final = (1-Z)*u + Z*tanh(U([R*u, i])); R,Z come from ONE fused matmul.
    a   = data_ref[OFF_CROSS:OFF_PAIR, :]                      # [56, 128]
    ui  = a[:, 0:2 * D]                                        # [u | i]
    u   = a[:, 0:D]
    itm = a[:, D:2 * D]
    rz  = _sigmoid(jnp.dot(ui, w_rz, preferred_element_type=f32) + b_rz)
    r, z = rz[:, 0:D], rz[:, D:2 * D]
    ru_cat = jnp.concatenate([r * u, itm], axis=-1)            # K-fused U input
    cand = jnp.tanh(jnp.dot(ru_cat, w_u, preferred_element_type=f32) + b_u)
    u_final = (1.0 - z) * u + z * cand                         # [56, 32]

    # ---------------- cross (BCE) loss, fully in-kernel ----------------------
    gt = a[0:RC_PAD, 2 * D:3 * D]          # labels (lane-broadcast)
    wc = a[0:RC_PAD, 3 * D:4 * D]          # 1.0 on real cross rows, 0 on pads
    sc = jnp.sum(u_final[0:RC_PAD] * itm[0:RC_PAD], axis=-1, keepdims=True)
    pr = jnp.clip(_sigmoid(sc), 1e-7, 1.0 - 1e-7)
    bce = -(gt * jnp.log(pr) + (1.0 - gt) * jnp.log(1.0 - pr))
    log_loss = _total(bce * wc) * (1.0 / (D * R_CROSS))

    # ---------------- masked neg-preference sum (interaction-major) ---------
    wn = a[OFF_NEG:OFF_PAIR, 3 * D:4 * D]                      # keep mask
    masked = u_final[OFF_NEG:OFF_PAIR, :] * wn                 # [40, 32]
    neg_pref = masked[0:NP, :]
    for l in range(1, L_INTER):
        neg_pref = neg_pref + masked[l * NP:(l + 1) * NP, :]   # [8, 32]

    # ---------------- attention_aggregate (eval: dropout = identity) --------
    bsec = data_ref[OFF_PAIR:OFF_KV, :]                        # [8, 128]
    q0, tar = bsec[:, 0:D], bsec[:, D:2 * D]
    it0, it1 = bsec[:, 2 * D:3 * D], bsec[:, 3 * D:4 * D]
    kv_in = data_ref[OFF_KV:OFF_UTAB, :][:, 0:D]               # [16, 32]

    q = jnp.dot(q0, w_q, preferred_element_type=f32)
    kvp = jnp.dot(kv_in, w_kv, preferred_element_type=f32)     # one matmul -> K|V
    k_all, v_all = kvp[:, 0:D], kvp[:, D:2 * D]

    inv_sqrt_d = 1.0 / math.sqrt(D)
    scores = [jnp.sum(q * k_all[j * NP:(j + 1) * NP, :], axis=-1, keepdims=True)
              * inv_sqrt_d for j in range(NBKV)]
    m = scores[0]
    for j in range(1, NBKV):
        m = jnp.maximum(m, scores[j])
    es = [jnp.exp(s - m) for s in scores]
    denom = es[0]
    for j in range(1, NBKV):
        denom = denom + es[j]
    inv_denom = pl.reciprocal(denom, approx=True)              # EUP, not VALU div
    attn = (es[0] * inv_denom) * v_all[0:NP, :]
    for j in range(1, NBKV):
        attn = attn + (es[j] * inv_denom) * v_all[j * NP:(j + 1) * NP, :]

    gate_a = _sigmoid(jnp.dot(q, w_gatt, preferred_element_type=f32) + b_gatt)
    fusion = gate_a * attn + (1.0 - gate_a) * q
    outp = jnp.dot(fusion, w_o, preferred_element_type=f32) + b_o
    mu = jnp.mean(outp, axis=-1, keepdims=True)
    var = jnp.mean((outp - mu) ** 2, axis=-1, keepdims=True)
    user_enh = (outp - mu) * jax.lax.rsqrt(var + 1e-5) * ln_g + ln_b
    # TODO(synk): pre_dis_layer (GraphDistillationLayer) is an external module;
    # the attention output passes through unchanged.

    # ---------------- gate_layer fusion + BPR losses -------------------------
    gcat = jnp.concatenate([user_enh, tar], axis=-1)           # K-fused gate input
    gate = _sigmoid(jnp.dot(gcat, w_gate, preferred_element_type=f32) + b_gate)
    final_u = gate * user_enh + (1.0 - gate) * tar

    p_sc = jnp.sum(final_u * it0, axis=-1, keepdims=True)      # [8, 1]
    n_sc = jnp.sum(final_u * it1, axis=-1, keepdims=True)
    neg_sc = jnp.sum(neg_pref * it0, axis=-1, keepdims=True)
    valid = (jax.lax.broadcasted_iota(jnp.int32, (NP, 1), 0) < N_PAIR).astype(f32)
    # TODO(synk): BPRLoss is an external class; standard -mean(logsigmoid(p-n)).
    bpr = -(_total(valid * _log_sigmoid(p_sc - n_sc))
            + _total(valid * _log_sigmoid(p_sc - neg_sc))) * (1.0 / N_PAIR)

    # ---------------- embedding L2 regularizer -------------------------------
    # TODO(synk): EmbLoss is an external class; standard L2 regularizer used.
    utab = data_ref[OFF_UTAB:OFF_ITAB, :]
    itab = data_ref[OFF_ITAB:R_DATA, :]
    emb = (jnp.sqrt(_total(utab * utab)) + jnp.sqrt(_total(itab * itab))) \
        * (1.0 / (N_ITEMS + 1))

    loss_ref[...] = LOG_REG * log_loss + (1.0 - LOG_REG) * bpr + REG_W * emb


# ------------------------------ kernel wrapper --------------------------------
def pure_mb_pallas(data_slab, w_slab, b_slab):
    vmem = pltpu.MemorySpace.VMEM
    # No grid: a single invocation with whole-array VMEM residency — avoids the
    # pipelining prologue/epilogue and double buffers of a 1-step grid.
    return pl.pallas_call(
        fused_kernel,
        out_shape=jax.ShapeDtypeStruct((1, 1), jnp.float32),
        in_specs=[pl.BlockSpec(memory_space=vmem)] * 3,
        out_specs=pl.BlockSpec(memory_space=vmem),
    )(data_slab, w_slab, b_slab)


# ------------------------------ parameters -----------------------------------
def init_params(key):
    ks = jax.random.split(key, 10)
    scl = 0.1
    p = {}
    p["user_emb"] = (jax.random.normal(ks[0], (N_USERS + 1, D)) * scl
                     ).at[0].set(0.0)                         # padding_idx=0
    p["item_emb"] = (jax.random.normal(ks[1], (N_ITEMS + 1, D)) * scl
                     ).at[0].set(0.0)
    p["W_RZ"] = jax.random.normal(ks[2], (2 * D, 2 * D)) * scl
    p["b_RZ"] = jnp.zeros((2 * D,))
    p["W_U"] = jax.random.normal(ks[3], (D, 2 * D)) * scl
    p["b_U"] = jnp.zeros((D,))
    p["W_q"] = jax.random.normal(ks[4], (D, D)) * scl
    p["W_k"] = jax.random.normal(ks[5], (D, D)) * scl
    p["W_v"] = jax.random.normal(ks[6], (D, D)) * scl
    p["W_o"] = jax.random.normal(ks[7], (D, D)) * scl
    p["b_o"] = jnp.zeros((D,))
    p["W_gate_att"] = jax.random.normal(ks[8], (D, D)) * scl
    p["b_gate_att"] = jnp.zeros((D,))
    p["ln_gamma"] = jnp.ones((D,))
    p["ln_beta"] = jnp.zeros((D,))
    p["W_gate_layer"] = jax.random.normal(ks[9], (D, 2 * D)) * scl
    p["b_gate_layer"] = jnp.zeros((D,))
    return jax.tree_util.tree_map(lambda x: x.astype(jnp.float32), p)


def prep_kernel_params(p):
    """Pre-transpose torch Linear weights ([out,in] -> [in,out]) and stack
    everything into ONE weight slab + ONE bias slab (lanes padded to 64)."""
    def lpad(w):
        return jnp.pad(w, ((0, 0), (0, 2 * D - w.shape[1])))

    w_slab = jnp.concatenate([
        p["W_RZ"].T,                                           # rows   0..64
        lpad(p["W_U"].T),                                      # rows  64..128
        lpad(p["W_gate_layer"].T),                             # rows 128..192
        lpad(p["W_q"].T),                                      # rows 192..224
        jnp.concatenate([p["W_k"].T, p["W_v"].T], axis=-1),    # rows 224..256
        lpad(p["W_gate_att"].T),                               # rows 256..288
        lpad(p["W_o"].T),                                      # rows 288..320
    ], axis=0)
    assert w_slab.shape == (W_ROWS, 2 * D)

    def brow(b):
        return jnp.pad(b.reshape(1, -1), ((0, 0), (0, 2 * D - b.shape[0])))

    b_slab = jnp.concatenate([
        brow(p["b_RZ"]), brow(p["b_U"]), brow(p["b_gate_att"]), brow(p["b_o"]),
        brow(p["ln_gamma"]), brow(p["ln_beta"]), brow(p["b_gate_layer"]),
        jnp.zeros((1, 2 * D), jnp.float32)], axis=0)           # [8, 64]

    return {"w_slab": w_slab.astype(jnp.float32),
            "b_slab": b_slab.astype(jnp.float32)}


# ------------------------------ forward ---------------------------------------
def pure_mb_forward(p, kp, batch_data, inter_padded):
    user_w = p["user_emb"]
    item_w = p["item_emb"]
    f32 = jnp.float32

    # TODO(synk): global_Graph / behavior_Graph_list (LightGCN over the dataset
    # sparse adjacency) are external modules; graph propagation is skipped, so
    # every behavior shares the raw embedding tables and behavior-indexed
    # lookups collapse to plain table lookups.

    # -------- calculate_cross_loss rows --------
    p_samples = batch_data[:, 0, :]
    n_samples = batch_data[:, 1:-1, :].reshape(-1, 4)
    samples = jnp.concatenate([p_samples, n_samples], axis=0)       # [R_CROSS, 4]
    u_emb_sel = user_w[samples[:, 0]]
    i_emb_sel = item_w[samples[:, 1]]
    gt = samples[:, 3].astype(f32)

    # -------- pairwise (BPR) rows --------
    # Synthetic batch: every pair row is non-zero, so torch's mask-select is the
    # identity here.
    pair = batch_data[:, -1, :-1]
    user_samples = pair[:, 0]
    item_samples = pair[:, 1:]
    i_emb_tar = item_w[item_samples]                                # [N_PAIR, 2, D]
    u_pair = user_w[user_samples]                                   # [N_PAIR, D]
    # TODO(synk): self.transformer (LinearTransformer) is an external module;
    # the target-behavior user embedding is used directly in its place.
    tar_enh = user_w[user_samples] + u_pair * 2.0

    padded = inter_padded[user_samples]                             # [N_PAIR, L]
    keep = (padded != 0).astype(f32)
    agg_item = item_w[padded]                                       # [N_PAIR, L, D]

    # -------- assemble the single lane-dense data slab [R_DATA, 4*D] --------
    cross = jnp.concatenate([
        u_emb_sel, i_emb_sel,
        jnp.broadcast_to(gt[:, None], (R_CROSS, D)),
        jnp.ones((R_CROSS, D), f32)], axis=-1)
    cross = jnp.pad(cross, ((0, RC_PAD - R_CROSS), (0, 0)))

    u_neg = jnp.broadcast_to(u_pair[None], (L_INTER, N_PAIR, D))
    i_neg = jnp.transpose(agg_item, (1, 0, 2))
    w_neg = jnp.broadcast_to(jnp.transpose(keep)[:, :, None],
                             (L_INTER, N_PAIR, D))
    neg = jnp.concatenate([u_neg, i_neg, jnp.zeros_like(u_neg), w_neg], axis=-1)
    neg = jnp.pad(neg, ((0, 0), (0, NP - N_PAIR), (0, 0))).reshape(NEG_ROWS, 4 * D)

    pairs = jnp.concatenate([u_pair, tar_enh, i_emb_tar[:, 0], i_emb_tar[:, 1]],
                            axis=-1)
    pairs = jnp.pad(pairs, ((0, NP - N_PAIR), (0, 0)))

    kv = jnp.tile(jnp.pad(u_pair, ((0, NP - N_PAIR), (0, 0))), (NBKV, 1))
    kv = jnp.pad(kv, ((0, 0), (0, 3 * D)))

    utab = jnp.pad(user_w, ((0, UTAB_ROWS - (N_USERS + 1)), (0, 3 * D)))
    itab = jnp.pad(item_w, ((0, ITAB_ROWS - (N_ITEMS + 1)), (0, 3 * D)))

    data = jnp.concatenate([cross, neg, pairs, kv, utab, itab], axis=0)

    loss = pure_mb_pallas(data, kp["w_slab"], kp["b_slab"])
    return loss[0, 0]


# ------------------------------ main ------------------------------------------
if __name__ == "__main__":
    key = jax.random.PRNGKey(0)
    k_param, k_u, k_pi, k_ni, k_b = jax.random.split(key, 5)

    params = init_params(k_param)
    kparams = prep_kernel_params(params)

    # batch_data: [NB, S, 4] int32  rows = [positive, negatives..., pair]
    u = jax.random.randint(k_u, (NB,), 1, N_USERS + 1)
    pos_i = jax.random.randint(k_pi, (NB,), 1, N_ITEMS + 1)
    neg_i = jax.random.randint(k_ni, (NB, S - 2), 1, N_ITEMS + 1)
    b = jax.random.randint(k_b, (NB,), 0, N_BEH)

    pos_row = jnp.stack([u, pos_i, b, jnp.ones_like(u)], axis=-1)[:, None, :]
    neg_rows = jnp.stack(
        [jnp.broadcast_to(u[:, None], neg_i.shape), neg_i,
         jnp.broadcast_to(b[:, None], neg_i.shape), jnp.zeros_like(neg_i)],
        axis=-1)
    pair_row = jnp.stack([u, pos_i, neg_i[:, 0], jnp.zeros_like(u)],
                         axis=-1)[:, None, :]
    batch_data = jnp.concatenate([pos_row, neg_rows, pair_row],
                                 axis=1).astype(jnp.int32)

    # deterministic padded user->item interaction lists (0 = padding)
    uid = jnp.arange(N_USERS + 1)
    lens = (uid % L_INTER) + 1
    j = jnp.arange(L_INTER)
    items = ((uid[:, None] * 3 + j[None, :]) % N_ITEMS) + 1
    inter_padded = jnp.where(j[None, :] < lens[:, None], items, 0
                             ).astype(jnp.int32)

    loss = jax.jit(pure_mb_forward)(params, kparams, batch_data, inter_padded)
    loss = jax.block_until_ready(loss)
    assert jnp.isfinite(loss)
    print("KERNEL_OK")
</pallas_src>

<mosaic_0001>
module attributes {stable_mosaic.version = 11 : i64} {
  func.func @fused_kernel(%arg0: memref<120x128xf32, #tpu.memory_space<vmem>>, %arg1: memref<320x64xf32, #tpu.memory_space<vmem>>, %arg2: memref<8x64xf32, #tpu.memory_space<vmem>>, %arg3: memref<1x1xf32, #tpu.memory_space<vmem>>) attributes {dimension_semantics = [], scalar_prefetch = 0 : i64, scratch_operands = 0 : i64, tpu.core_type = #tpu.core_type<tc>} {
    %c0 = arith.constant 0 : index
    %c0_0 = arith.constant 0 : index
    %0 = vector.load %arg1[%c0, %c0_0] : memref<320x64xf32, #tpu.memory_space<vmem>>, vector<64x64xf32>
    %c64 = arith.constant 64 : index
    %c0_1 = arith.constant 0 : index
    %1 = vector.load %arg1[%c64, %c0_1] : memref<320x64xf32, #tpu.memory_space<vmem>>, vector<64x64xf32>
    %2 = vector.extract_strided_slice %1 {offsets = [0, 0], sizes = [64, 32], strides = [1, 1]} : vector<64x64xf32> to vector<64x32xf32>
    %c128 = arith.constant 128 : index
    %c0_2 = arith.constant 0 : index
    %3 = vector.load %arg1[%c128, %c0_2] : memref<320x64xf32, #tpu.memory_space<vmem>>, vector<64x64xf32>
    %4 = vector.extract_strided_slice %3 {offsets = [0, 0], sizes = [64, 32], strides = [1, 1]} : vector<64x64xf32> to vector<64x32xf32>
    %c192 = arith.constant 192 : index
    %c0_3 = arith.constant 0 : index
    %5 = vector.load %arg1[%c192, %c0_3] : memref<320x64xf32, #tpu.memory_space<vmem>>, vector<32x64xf32>
    %6 = vector.extract_strided_slice %5 {offsets = [0, 0], sizes = [32, 32], strides = [1, 1]} : vector<32x64xf32> to vector<32x32xf32>
    %c224 = arith.constant 224 : index
    %c0_4 = arith.constant 0 : index
    %7 = vector.load %arg1[%c224, %c0_4] : memref<320x64xf32, #tpu.memory_space<vmem>>, vector<32x64xf32>
    %c256 = arith.constant 256 : index
    %c0_5 = arith.constant 0 : index
    %8 = vector.load %arg1[%c256, %c0_5] : memref<320x64xf32, #tpu.memory_space<vmem>>, vector<32x64xf32>
    %9 = vector.extract_strided_slice %8 {offsets = [0, 0], sizes = [32, 32], strides = [1, 1]} : vector<32x64xf32> to vector<32x32xf32>
    %c288 = arith.constant 288 : index
    %c0_6 = arith.constant 0 : index
    %10 = vector.load %arg1[%c288, %c0_6] : memref<320x64xf32, #tpu.memory_space<vmem>>, vector<32x64xf32>
    %11 = vector.extract_strided_slice %10 {offsets = [0, 0], sizes = [32, 32], strides = [1, 1]} : vector<32x64xf32> to vector<32x32xf32>
    %c0_7 = arith.constant 0 : index
    %c0_8 = arith.constant 0 : index
    %12 = vector.load %arg2[%c0_7, %c0_8] : memref<8x64xf32, #tpu.memory_space<vmem>>, vector<8x64xf32>
    %13 = vector.extract_strided_slice %12 {offsets = [0, 0], sizes = [1, 64], strides = [1, 1]} : vector<8x64xf32> to vector<1x64xf32>
    %14 = vector.extract_strided_slice %12 {offsets = [1, 0], sizes = [1, 32], strides = [1, 1]} : vector<8x64xf32> to vector<1x32xf32>
    %15 = vector.extract_strided_slice %12 {offsets = [2, 0], sizes = [1, 32], strides = [1, 1]} : vector<8x64xf32> to vector<1x32xf32>
    %16 = vector.extract_strided_slice %12 {offsets = [3, 0], sizes = [1, 32], strides = [1, 1]} : vector<8x64xf32> to vector<1x32xf32>
    %17 = vector.extract_strided_slice %12 {offsets = [4, 0], sizes = [1, 32], strides = [1, 1]} : vector<8x64xf32> to vector<1x32xf32>
    %18 = vector.extract_strided_slice %12 {offsets = [5, 0], sizes = [1, 32], strides = [1, 1]} : vector<8x64xf32> to vector<1x32xf32>
    %19 = vector.extract_strided_slice %12 {offsets = [6, 0], sizes = [1, 32], strides = [1, 1]} : vector<8x64xf32> to vector<1x32xf32>
    %c0_9 = arith.constant 0 : index
    %c0_10 = arith.constant 0 : index
    %20 = vector.load %arg0[%c0_9, %c0_10] : memref<120x128xf32, #tpu.memory_space<vmem>>, vector<56x128xf32>
    %21 = vector.extract_strided_slice %20 {offsets = [0, 0], sizes = [56, 64], strides = [1, 1]} : vector<56x128xf32> to vector<56x64xf32>
    %22 = vector.extract_strided_slice %20 {offsets = [0, 0], sizes = [56, 32], strides = [1, 1]} : vector<56x128xf32> to vector<56x32xf32>
    %23 = vector.extract_strided_slice %20 {offsets = [0, 32], sizes = [56, 32], strides = [1, 1]} : vector<56x128xf32> to vector<56x32xf32>
    %cst = arith.constant dense<0.000000e+00> : vector<56x64xf32>
    %24 = tpu.matmul %21, %0, %cst {dimension_numbers = #tpu.dot_dimension_numbers<[1], [0], [0], [1], [0, 0, 1, 1], [], []>} : vector<56x64xf32>, vector<64x64xf32>, vector<56x64xf32> -> vector<56x64xf32>
    %25 = vector.broadcast %13 : vector<1x64xf32> to vector<56x64xf32>
    %26 = arith.addf %24, %25 : vector<56x64xf32>
    %cst_11 = arith.constant 0.000000e+00 : f32
    %27 = vector.broadcast %cst_11 : f32 to vector<56x64xf32>
    %28 = arith.subf %27, %26 : vector<56x64xf32>
    %29 = math.exp %28 : vector<56x64xf32>
    %cst_12 = arith.constant 1.000000e+00 : f32
    %30 = vector.broadcast %cst_12 : f32 to vector<56x64xf32>
    %31 = arith.addf %30, %29 : vector<56x64xf32>
    %cst_13 = arith.constant 1.000000e+00 : f32
    %32 = vector.broadcast %cst_13 : f32 to vector<56x64xf32>
    %33 = arith.divf %32, %31 : vector<56x64xf32>
    %34 = vector.extract_strided_slice %33 {offsets = [0, 0], sizes = [56, 32], strides = [1, 1]} : vector<56x64xf32> to vector<56x32xf32>
    %35 = vector.extract_strided_slice %33 {offsets = [0, 32], sizes = [56, 32], strides = [1, 1]} : vector<56x64xf32> to vector<56x32xf32>
    %36 = arith.mulf %34, %22 : vector<56x32xf32>
    %37 = tpu.concatenate %36, %23 in 1 : vector<56x32xf32>, vector<56x32xf32> -> vector<56x64xf32>
    %cst_14 = arith.constant dense<0.000000e+00> : vector<56x32xf32>
    %38 = tpu.matmul %37, %2, %cst_14 {dimension_numbers = #tpu.dot_dimension_numbers<[1], [0], [0], [1], [0, 0, 1, 1], [], []>} : vector<56x64xf32>, vector<64x32xf32>, vector<56x32xf32> -> vector<56x32xf32>
    %39 = vector.broadcast %14 : vector<1x32xf32> to vector<56x32xf32>
    %40 = arith.addf %38, %39 : vector<56x32xf32>
    %41 = math.tanh %40 : vector<56x32xf32>
    %cst_15 = arith.constant 1.000000e+00 : f32
    %42 = vector.broadcast %cst_15 : f32 to vector<56x32xf32>
    %43 = arith.subf %42, %35 : vector<56x32xf32>
    %44 = arith.mulf %43, %22 : vector<56x32xf32>
    %45 = arith.mulf %35, %41 : vector<56x32xf32>
    %46 = arith.addf %44, %45 : vector<56x32xf32>
    %47 = vector.extract_strided_slice %20 {offsets = [0, 64], sizes = [16, 32], strides = [1, 1]} : vector<56x128xf32> to vector<16x32xf32>
    %48 = vector.extract_strided_slice %20 {offsets = [0, 96], sizes = [16, 32], strides = [1, 1]} : vector<56x128xf32> to vector<16x32xf32>
    %49 = vector.extract_strided_slice %46 {offsets = [0, 0], sizes = [16, 32], strides = [1, 1]} : vector<56x32xf32> to vector<16x32xf32>
    %50 = vector.extract_strided_slice %23 {offsets = [0, 0], sizes = [16, 32], strides = [1, 1]} : vector<56x32xf32> to vector<16x32xf32>
    %51 = arith.mulf %49, %50 : vector<16x32xf32>
    %cst_16 = arith.constant dense<0.000000e+00> : vector<16xf32>
    %52 = vector.multi_reduction <add>, %51, %cst_16 [1] : vector<16x32xf32> to vector<16xf32>
    %53 = vector.shape_cast %52 : vector<16xf32> to vector<16x1xf32>
    %cst_17 = arith.constant 0.000000e+00 : f32
    %54 = vector.broadcast %cst_17 : f32 to vector<16x1xf32>
    %55 = arith.subf %54, %53 : vector<16x1xf32>
    %56 = math.exp %55 : vector<16x1xf32>
    %cst_18 = arith.constant 1.000000e+00 : f32
    %57 = vector.broadcast %cst_18 : f32 to vector<16x1xf32>
    %58 = arith.addf %57, %56 : vector<16x1xf32>
    %cst_19 = arith.constant 1.000000e+00 : f32
    %59 = vector.broadcast %cst_19 : f32 to vector<16x1xf32>
    %60 = arith.divf %59, %58 : vector<16x1xf32>
    %cst_20 = arith.constant 1.000000e-07 : f32
    %cst_21 = arith.constant 0.99999988 : f32
    %61 = vector.broadcast %cst_20 : f32 to vector<16x1xf32>
    %62 = arith.maximumf %61, %60 : vector<16x1xf32>
    %63 = vector.broadcast %cst_21 : f32 to vector<16x1xf32>
    %64 = arith.minimumf %63, %62 : vector<16x1xf32>
    %65 = math.log %64 : vector<16x1xf32>
    %66 = vector.broadcast %65 : vector<16x1xf32> to vector<16x32xf32>
    %67 = arith.mulf %47, %66 : vector<16x32xf32>
    %cst_22 = arith.constant 1.000000e+00 : f32
    %68 = vector.broadcast %cst_22 : f32 to vector<16x32xf32>
    %69 = arith.subf %68, %47 : vector<16x32xf32>
    %cst_23 = arith.constant 1.000000e+00 : f32
    %70 = vector.broadcast %cst_23 : f32 to vector<16x1xf32>
    %71 = arith.subf %70, %64 : vector<16x1xf32>
    %72 = math.log %71 : vector<16x1xf32>
    %73 = vector.broadcast %72 : vector<16x1xf32> to vector<16x32xf32>
    %74 = arith.mulf %69, %73 : vector<16x32xf32>
    %75 = arith.addf %67, %74 : vector<16x32xf32>
    %cst_24 = arith.constant 0.000000e+00 : f32
    %76 = vector.broadcast %cst_24 : f32 to vector<16x32xf32>
    %77 = arith.subf %76, %75 : vector<16x32xf32>
    %78 = arith.mulf %77, %48 : vector<16x32xf32>
    %cst_25 = arith.constant dense<0.000000e+00> : vector<16xf32>
    %79 = vector.multi_reduction <add>, %78, %cst_25 [1] : vector<16x32xf32> to vector<16xf32>
    %80 = vector.shape_cast %79 : vector<16xf32> to vector<16x1xf32>
    %cst_26 = arith.constant dense<0.000000e+00> : vector<1xf32>
    %81 = vector.multi_reduction <add>, %80, %cst_26 [0] : vector<16x1xf32> to vector<1xf32>
    %82 = vector.shape_cast %81 : vector<1xf32> to vector<1x1xf32>
    %cst_27 = arith.constant 0.00260416674 : f32
    %83 = vector.broadcast %cst_27 : f32 to vector<1x1xf32>
    %84 = arith.mulf %82, %83 : vector<1x1xf32>
    %85 = vector.extract_strided_slice %20 {offsets = [16, 96], sizes = [40, 32], strides = [1, 1]} : vector<56x128xf32> to vector<40x32xf32>
    %86 = vector.extract_strided_slice %46 {offsets = [16, 0], sizes = [40, 32], strides = [1, 1]} : vector<56x32xf32> to vector<40x32xf32>
    %87 = arith.mulf %86, %85 : vector<40x32xf32>
    %88 = vector.extract_strided_slice %87 {offsets = [0, 0], sizes = [8, 32], strides = [1, 1]} : vector<40x32xf32> to vector<8x32xf32>
    %89 = vector.extract_strided_slice %87 {offsets = [8, 0], sizes = [8, 32], strides = [1, 1]} : vector<40x32xf32> to vector<8x32xf32>
    %90 = arith.addf %88, %89 : vector<8x32xf32>
    %91 = vector.extract_strided_slice %87 {offsets = [16, 0], sizes = [8, 32], strides = [1, 1]} : vector<40x32xf32> to vector<8x32xf32>
    %92 = arith.addf %90, %91 : vector<8x32xf32>
    %93 = vector.extract_strided_slice %87 {offsets = [24, 0], sizes = [8, 32], strides = [1, 1]} : vector<40x32xf32> to vector<8x32xf32>
    %94 = arith.addf %92, %93 : vector<8x32xf32>
    %95 = vector.extract_strided_slice %87 {offsets = [32, 0], sizes = [8, 32], strides = [1, 1]} : vector<40x32xf32> to vector<8x32xf32>
    %96 = arith.addf %94, %95 : vector<8x32xf32>
    %c56 = arith.constant 56 : index
    %c0_28 = arith.constant 0 : index
    %97 = vector.load %arg0[%c56, %c0_28] : memref<120x128xf32, #tpu.memory_space<vmem>>, vector<8x128xf32>
    %98 = vector.extract_strided_slice %97 {offsets = [0, 0], sizes = [8, 32], strides = [1, 1]} : vector<8x128xf32> to vector<8x32xf32>
    %99 = vector.extract_strided_slice %97 {offsets = [0, 32], sizes = [8, 32], strides = [1, 1]} : vector<8x128xf32> to vector<8x32xf32>
    %100 = vector.extract_strided_slice %97 {offsets = [0, 64], sizes = [8, 32], strides = [1, 1]} : vector<8x128xf32> to vector<8x32xf32>
    %101 = vector.extract_strided_slice %97 {offsets = [0, 96], sizes = [8, 32], strides = [1, 1]} : vector<8x128xf32> to vector<8x32xf32>
    %c64_29 = arith.constant 64 : index
    %c0_30 = arith.constant 0 : index
    %102 = vector.load %arg0[%c64_29, %c0_30] : memref<120x128xf32, #tpu.memory_space<vmem>>, vector<16x128xf32>
    %103 = vector.extract_strided_slice %102 {offsets = [0, 0], sizes = [16, 32], strides = [1, 1]} : vector<16x128xf32> to vector<16x32xf32>
    %cst_31 = arith.constant dense<0.000000e+00> : vector<8x32xf32>
    %104 = tpu.matmul %98, %6, %cst_31 {dimension_numbers = #tpu.dot_dimension_numbers<[1], [0], [0], [1], [0, 0, 1, 1], [], []>} : vector<8x32xf32>, vector<32x32xf32>, vector<8x32xf32> -> vector<8x32xf32>
    %cst_32 = arith.constant dense<0.000000e+00> : vector<16x64xf32>
    %105 = tpu.matmul %103, %7, %cst_32 {dimension_numbers = #tpu.dot_dimension_numbers<[1], [0], [0], [1], [0, 0, 1, 1], [], []>} : vector<16x32xf32>, vector<32x64xf32>, vector<16x64xf32> -> vector<16x64xf32>
    %106 = vector.extract_strided_slice %105 {offsets = [0, 0], sizes = [16, 32], strides = [1, 1]} : vector<16x64xf32> to vector<16x32xf32>
    %107 = vector.extract_strided_slice %105 {offsets = [0, 32], sizes = [16, 32], strides = [1, 1]} : vector<16x64xf32> to vector<16x32xf32>
    %108 = vector.extract_strided_slice %106 {offsets = [0, 0], sizes = [8, 32], strides = [1, 1]} : vector<16x32xf32> to vector<8x32xf32>
    %109 = arith.mulf %104, %108 : vector<8x32xf32>
    %cst_33 = arith.constant dense<0.000000e+00> : vector<8xf32>
    %110 = vector.multi_reduction <add>, %109, %cst_33 [1] : vector<8x32xf32> to vector<8xf32>
    %111 = vector.shape_cast %110 : vector<8xf32> to vector<8x1xf32>
    %cst_34 = arith.constant 0.176776692 : f32
    %112 = vector.broadcast %cst_34 : f32 to vector<8x1xf32>
    %113 = arith.mulf %111, %112 : vector<8x1xf32>
    %114 = vector.extract_strided_slice %106 {offsets = [8, 0], sizes = [8, 32], strides = [1, 1]} : vector<16x32xf32> to vector<8x32xf32>
    %115 = arith.mulf %104, %114 : vector<8x32xf32>
    %cst_35 = arith.constant dense<0.000000e+00> : vector<8xf32>
    %116 = vector.multi_reduction <add>, %115, %cst_35 [1] : vector<8x32xf32> to vector<8xf32>
    %117 = vector.shape_cast %116 : vector<8xf32> to vector<8x1xf32>
    %cst_36 = arith.constant 0.176776692 : f32
    %118 = vector.broadcast %cst_36 : f32 to vector<8x1xf32>
    %119 = arith.mulf %117, %118 : vector<8x1xf32>
    %120 = arith.maximumf %113, %119 : vector<8x1xf32>
    %121 = arith.subf %113, %120 : vector<8x1xf32>
    %122 = math.exp %121 : vector<8x1xf32>
    %123 = arith.subf %119, %120 : vector<8x1xf32>
    %124 = math.exp %123 : vector<8x1xf32>
    %125 = arith.addf %122, %124 : vector<8x1xf32>
    %126 = tpu.reciprocal %125 {approx = true} : vector<8x1xf32> -> vector<8x1xf32>
    %127 = arith.mulf %122, %126 : vector<8x1xf32>
    %128 = vector.extract_strided_slice %107 {offsets = [0, 0], sizes = [8, 32], strides = [1, 1]} : vector<16x32xf32> to vector<8x32xf32>
    %129 = vector.broadcast %127 : vector<8x1xf32> to vector<8x32xf32>
    %130 = arith.mulf %129, %128 : vector<8x32xf32>
    %131 = arith.mulf %124, %126 : vector<8x1xf32>
    %132 = vector.extract_strided_slice %107 {offsets = [8, 0], sizes = [8, 32], strides = [1, 1]} : vector<16x32xf32> to vector<8x32xf32>
    %133 = vector.broadcast %131 : vector<8x1xf32> to vector<8x32xf32>
    %134 = arith.mulf %133, %132 : vector<8x32xf32>
    %135 = arith.addf %130, %134 : vector<8x32xf32>
    %cst_37 = arith.constant dense<0.000000e+00> : vector<8x32xf32>
    %136 = tpu.matmul %104, %9, %cst_37 {dimension_numbers = #tpu.dot_dimension_numbers<[1], [0], [0], [1], [0, 0, 1, 1], [], []>} : vector<8x32xf32>, vector<32x32xf32>, vector<8x32xf32> -> vector<8x32xf32>
    %137 = vector.broadcast %15 : vector<1x32xf32> to vector<8x32xf32>
    %138 = arith.addf %136, %137 : vector<8x32xf32>
    %cst_38 = arith.constant 0.000000e+00 : f32
    %139 = vector.broadcast %cst_38 : f32 to vector<8x32xf32>
    %140 = arith.subf %139, %138 : vector<8x32xf32>
    %141 = math.exp %140 : vector<8x32xf32>
    %cst_39 = arith.constant 1.000000e+00 : f32
    %142 = vector.broadcast %cst_39 : f32 to vector<8x32xf32>
    %143 = arith.addf %142, %141 : vector<8x32xf32>
    %cst_40 = arith.constant 1.000000e+00 : f32
    %144 = vector.broadcast %cst_40 : f32 to vector<8x32xf32>
    %145 = arith.divf %144, %143 : vector<8x32xf32>
    %146 = arith.mulf %145, %135 : vector<8x32xf32>
    %cst_41 = arith.constant 1.000000e+00 : f32
    %147 = vector.broadcast %cst_41 : f32 to vector<8x32xf32>
    %148 = arith.subf %147, %145 : vector<8x32xf32>
    %149 = arith.mulf %148, %104 : vector<8x32xf32>
    %150 = arith.addf %146, %149 : vector<8x32xf32>
    %cst_42 = arith.constant dense<0.000000e+00> : vector<8x32xf32>
    %151 = tpu.matmul %150, %11, %cst_42 {dimension_numbers = #tpu.dot_dimension_numbers<[1], [0], [0], [1], [0, 0, 1, 1], [], []>} : vector<8x32xf32>, vector<32x32xf32>, vector<8x32xf32> -> vector<8x32xf32>
    %152 = vector.broadcast %16 : vector<1x32xf32> to vector<8x32xf32>
    %153 = arith.addf %151, %152 : vector<8x32xf32>
    %cst_43 = arith.constant dense<0.000000e+00> : vector<8xf32>
    %154 = vector.multi_reduction <add>, %153, %cst_43 [1] : vector<8x32xf32> to vector<8xf32>
    %155 = vector.shape_cast %154 : vector<8xf32> to vector<8x1xf32>
    %cst_44 = arith.constant 3.200000e+01 : f32
    %156 = vector.broadcast %cst_44 : f32 to vector<8x1xf32>
    %157 = arith.divf %155, %156 : vector<8x1xf32>
    %158 = vector.broadcast %157 : vector<8x1xf32> to vector<8x32xf32>
    %159 = arith.subf %153, %158 : vector<8x32xf32>
    %160 = arith.mulf %159, %159 : vector<8x32xf32>
    %cst_45 = arith.constant dense<0.000000e+00> : vector<8xf32>
    %161 = vector.multi_reduction <add>, %160, %cst_45 [1] : vector<8x32xf32> to vector<8xf32>
    %162 = vector.shape_cast %161 : vector<8xf32> to vector<8x1xf32>
    %cst_46 = arith.constant 3.200000e+01 : f32
    %163 = vector.broadcast %cst_46 : f32 to vector<8x1xf32>
    %164 = arith.divf %162, %163 : vector<8x1xf32>
    %165 = vector.broadcast %157 : vector<8x1xf32> to vector<8x32xf32>
    %166 = arith.subf %153, %165 : vector<8x32xf32>
    %cst_47 = arith.constant 9.99999974E-6 : f32
    %167 = vector.broadcast %cst_47 : f32 to vector<8x1xf32>
    %168 = arith.addf %164, %167 : vector<8x1xf32>
    %169 = math.rsqrt %168 : vector<8x1xf32>
    %170 = vector.broadcast %169 : vector<8x1xf32> to vector<8x32xf32>
    %171 = arith.mulf %166, %170 : vector<8x32xf32>
    %172 = vector.broadcast %17 : vector<1x32xf32> to vector<8x32xf32>
    %173 = arith.mulf %171, %172 : vector<8x32xf32>
    %174 = vector.broadcast %18 : vector<1x32xf32> to vector<8x32xf32>
    %175 = arith.addf %173, %174 : vector<8x32xf32>
    %176 = tpu.concatenate %175, %99 in 1 : vector<8x32xf32>, vector<8x32xf32> -> vector<8x64xf32>
    %cst_48 = arith.constant dense<0.000000e+00> : vector<8x32xf32>
    %177 = tpu.matmul %176, %4, %cst_48 {dimension_numbers = #tpu.dot_dimension_numbers<[1], [0], [0], [1], [0, 0, 1, 1], [], []>} : vector<8x64xf32>, vector<64x32xf32>, vector<8x32xf32> -> vector<8x32xf32>
    %178 = vector.broadcast %19 : vector<1x32xf32> to vector<8x32xf32>
    %179 = arith.addf %177, %178 : vector<8x32xf32>
    %cst_49 = arith.constant 0.000000e+00 : f32
    %180 = vector.broadcast %cst_49 : f32 to vector<8x32xf32>
    %181 = arith.subf %180, %179 : vector<8x32xf32>
    %182 = math.exp %181 : vector<8x32xf32>
    %cst_50 = arith.constant 1.000000e+00 : f32
    %183 = vector.broadcast %cst_50 : f32 to vector<8x32xf32>
    %184 = arith.addf %183, %182 : vector<8x32xf32>
    %cst_51 = arith.constant 1.000000e+00 : f32
    %185 = vector.broadcast %cst_51 : f32 to vector<8x32xf32>
    %186 = arith.divf %185, %184 : vector<8x32xf32>
    %187 = arith.mulf %186, %175 : vector<8x32xf32>
    %cst_52 = arith.constant 1.000000e+00 : f32
    %188 = vector.broadcast %cst_52 : f32 to vector<8x32xf32>
    %189 = arith.subf %188, %186 : vector<8x32xf32>
    %190 = arith.mulf %189, %99 : vector<8x32xf32>
    %191 = arith.addf %187, %190 : vector<8x32xf32>
    %192 = arith.mulf %191, %100 : vector<8x32xf32>
    %cst_53 = arith.constant dense<0.000000e+00> : vector<8xf32>
    %193 = vector.multi_reduction <add>, %192, %cst_53 [1] : vector<8x32xf32> to vector<8xf32>
    %194 = vector.shape_cast %193 : vector<8xf32> to vector<8x1xf32>
    %195 = arith.mulf %191, %101 : vector<8x32xf32>
    %cst_54 = arith.constant dense<0.000000e+00> : vector<8xf32>
    %196 = vector.multi_reduction <add>, %195, %cst_54 [1] : vector<8x32xf32> to vector<8xf32>
    %197 = vector.shape_cast %196 : vector<8xf32> to vector<8x1xf32>
    %198 = arith.mulf %96, %100 : vector<8x32xf32>
    %cst_55 = arith.constant dense<0.000000e+00> : vector<8xf32>
    %199 = vector.multi_reduction <add>, %198, %cst_55 [1] : vector<8x32xf32> to vector<8xf32>
    %200 = vector.shape_cast %199 : vector<8xf32> to vector<8x1xf32>
    %201 = tpu.iota {dimensions = array<i32: 0>} : vector<8x1xi32>
    %c4_i32 = arith.constant 4 : i32
    %202 = vector.broadcast %c4_i32 : i32 to vector<8x1xi32>
    %203 = arith.cmpi slt, %201, %202 : vector<8x1xi32>
    %204 = arith.extui %203 : vector<8x1xi1> to vector<8x1xi32>
    %205 = arith.sitofp %204 : vector<8x1xi32> to vector<8x1xf32>
    %206 = arith.subf %194, %197 : vector<8x1xf32>
    %cst_56 = arith.constant 0.000000e+00 : f32
    %207 = vector.broadcast %cst_56 : f32 to vector<8x1xf32>
    %208 = arith.minimumf %206, %207 : vector<8x1xf32>
    %209 = math.absf %206 : vector<8x1xf32>
    %cst_57 = arith.constant 0.000000e+00 : f32
    %210 = vector.broadcast %cst_57 : f32 to vector<8x1xf32>
    %211 = arith.subf %210, %209 : vector<8x1xf32>
    %212 = math.exp %211 : vector<8x1xf32>
    %cst_58 = arith.constant 1.000000e+00 : f32
    %213 = vector.broadcast %cst_58 : f32 to vector<8x1xf32>
    %214 = arith.addf %213, %212 : vector<8x1xf32>
    %215 = math.log %214 : vector<8x1xf32>
    %216 = arith.subf %208, %215 : vector<8x1xf32>
    %217 = arith.mulf %205, %216 : vector<8x1xf32>
    %cst_59 = arith.constant dense<0.000000e+00> : vector<8xf32>
    %218 = vector.multi_reduction <add>, %217, %cst_59 [1] : vector<8x1xf32> to vector<8xf32>
    %219 = vector.shape_cast %218 : vector<8xf32> to vector<8x1xf32>
    %cst_60 = arith.constant dense<0.000000e+00> : vector<1xf32>
    %220 = vector.multi_reduction <add>, %219, %cst_60 [0] : vector<8x1xf32> to vector<1xf32>
    %221 = vector.shape_cast %220 : vector<1xf32> to vector<1x1xf32>
    %222 = arith.subf %194, %200 : vector<8x1xf32>
    %cst_61 = arith.constant 0.000000e+00 : f32
    %223 = vector.broadcast %cst_61 : f32 to vector<8x1xf32>
    %224 = arith.minimumf %222, %223 : vector<8x1xf32>
    %225 = math.absf %222 : vector<8x1xf32>
    %cst_62 = arith.constant 0.000000e+00 : f32
    %226 = vector.broadcast %cst_62 : f32 to vector<8x1xf32>
    %227 = arith.subf %226, %225 : vector<8x1xf32>
    %228 = math.exp %227 : vector<8x1xf32>
    %cst_63 = arith.constant 1.000000e+00 : f32
    %229 = vector.broadcast %cst_63 : f32 to vector<8x1xf32>
    %230 = arith.addf %229, %228 : vector<8x1xf32>
    %231 = math.log %230 : vector<8x1xf32>
    %232 = arith.subf %224, %231 : vector<8x1xf32>
    %233 = arith.mulf %205, %232 : vector<8x1xf32>
    %cst_64 = arith.constant dense<0.000000e+00> : vector<8xf32>
    %234 = vector.multi_reduction <add>, %233, %cst_64 [1] : vector<8x1xf32> to vector<8xf32>
    %235 = vector.shape_cast %234 : vector<8xf32> to vector<8x1xf32>
    %cst_65 = arith.constant dense<0.000000e+00> : vector<1xf32>
    %236 = vector.multi_reduction <add>, %235, %cst_65 [0] : vector<8x1xf32> to vector<1xf32>
    %237 = vector.shape_cast %236 : vector<1xf32> to vector<1x1xf32>
    %238 = arith.addf %221, %237 : vector<1x1xf32>
    %cst_66 = arith.constant 0.000000e+00 : f32
    %239 = vector.broadcast %cst_66 : f32 to vector<1x1xf32>
    %240 = arith.subf %239, %238 : vector<1x1xf32>
    %cst_67 = arith.constant 2.500000e-01 : f32
    %241 = vector.broadcast %cst_67 : f32 to vector<1x1xf32>
    %242 = arith.mulf %240, %241 : vector<1x1xf32>
    %c80 = arith.constant 80 : index
    %c0_68 = arith.constant 0 : index
    %243 = vector.load %arg0[%c80, %c0_68] : memref<120x128xf32, #tpu.memory_space<vmem>>, vector<16x128xf32>
    %c96 = arith.constant 96 : index
    %c0_69 = arith.constant 0 : index
    %244 = vector.load %arg0[%c96, %c0_69] : memref<120x128xf32, #tpu.memory_space<vmem>>, vector<24x128xf32>
    %245 = arith.mulf %243, %243 : vector<16x128xf32>
    %cst_70 = arith.constant dense<0.000000e+00> : vector<16xf32>
    %246 = vector.multi_reduction <add>, %245, %cst_70 [1] : vector<16x128xf32> to vector<16xf32>
    %247 = vector.shape_cast %246 : vector<16xf32> to vector<16x1xf32>
    %cst_71 = arith.constant dense<0.000000e+00> : vector<1xf32>
    %248 = vector.multi_reduction <add>, %247, %cst_71 [0] : vector<16x1xf32> to vector<1xf32>
    %249 = vector.shape_cast %248 : vector<1xf32> to vector<1x1xf32>
    %250 = math.sqrt %249 : vector<1x1xf32>
    %251 = arith.mulf %244, %244 : vector<24x128xf32>
    %cst_72 = arith.constant dense<0.000000e+00> : vector<24xf32>
    %252 = vector.multi_reduction <add>, %251, %cst_72 [1] : vector<24x128xf32> to vector<24xf32>
    %253 = vector.shape_cast %252 : vector<24xf32> to vector<24x1xf32>
    %cst_73 = arith.constant dense<0.000000e+00> : vector<1xf32>
    %254 = vector.multi_reduction <add>, %253, %cst_73 [0] : vector<24x1xf32> to vector<1xf32>
    %255 = vector.shape_cast %254 : vector<1xf32> to vector<1x1xf32>
    %256 = math.sqrt %255 : vector<1x1xf32>
    %257 = arith.addf %250, %256 : vector<1x1xf32>
    %cst_74 = arith.constant 0.0588235296 : f32
    %258 = vector.broadcast %cst_74 : f32 to vector<1x1xf32>
    %259 = arith.mulf %257, %258 : vector<1x1xf32>
    %cst_75 = arith.constant 5.000000e-01 : f32
    %260 = vector.broadcast %cst_75 : f32 to vector<1x1xf32>
    %261 = arith.mulf %260, %84 : vector<1x1xf32>
    %cst_76 = arith.constant 5.000000e-01 : f32
    %262 = vector.broadcast %cst_76 : f32 to vector<1x1xf32>
    %263 = arith.mulf %262, %242 : vector<1x1xf32>
    %264 = arith.addf %261, %263 : vector<1x1xf32>
    %cst_77 = arith.constant 1.000000e-03 : f32
    %265 = vector.broadcast %cst_77 : f32 to vector<1x1xf32>
    %266 = arith.mulf %265, %259 : vector<1x1xf32>
    %267 = arith.addf %264, %266 : vector<1x1xf32>
    %c0_78 = arith.constant 0 : index
    %c0_79 = arith.constant 0 : index
    %268 = vector.load %arg3[%c0_78, %c0_79] : memref<1x1xf32, #tpu.memory_space<vmem>>, vector<1x1xf32>
    tpu.vector_store %arg3[%c0_78, %c0_79], %267 {strides = array<i32>} : memref<1x1xf32, #tpu.memory_space<vmem>>, vector<1x1xf32>,
    return
  }
}

</mosaic_0001>

<bundles_post_ra>
// kernel: pure_mb_forward.1
= control target key start
LH: loop header
LB: loop body
LE: loop exit
PB: predicated region body
PF: predicated region fallthrough
CT: control target
= control target key end

     0   :  { %v1560_v3 = vmov 0.0|0.0   ;;  %vm1561_vm0 = vmmov 0   ;;  %v1562_v6 = vmov 0.0   ;;  %s2041_s0 = inlined_call_operand.vmem [shape: f32[120,128], index: 0, kind: input, shape index: {}]   ;;  %s2042_s1 = inlined_call_operand.vmem [shape: f32[320,64], index: 1, kind: input, shape index: {}]   ;;  %s2043_s2 = inlined_call_operand.vmem [shape: f32[8,64], index: 2, kind: input, shape index: {}]   ;;  %s2044_s3 = inlined_call_operand.hbm [shape: f32[1,1], index: 3, kind: output, shape index: {}]  }
   0x1   :  { %v15_v0 = vld [vmem:[%s2042_s1] sm:$0xff]  ;;  %v16_v1 = vld [vmem:[%s2042_s1 + $0x8] sm:$0xff]  ;;  %v17_v2 = vld [vmem:[%s2042_s1 + $0x10] sm:$0xff]  ;;  %1381 = vmatprep.subr.bf16.mxu0 %v1560_v3  ;;  %1260 = vmatprep.mubr.msk.f32.mxu0 %vm1561_vm0, %v1562_v6 }
   0x2   :  { %v1382_v4 = vpack.c.bf16 %v16_v1, %v15_v0  ;;  %v18_v5 = vld [vmem:[%s2042_s1 + $0x18] sm:$0xff]  ;;  %1393 = vmatprep.subr.bf16.mxu1 %v1560_v3  ;;  %1297 = vmatprep.mubr.msk.f32.mxu1 %vm1561_vm0, %v1562_v6  ;;  %v19_v8 = vld [vmem:[%s2042_s1 + $0x20] sm:$0xff]  ;;  %v20_v9 = vld [vmem:[%s2042_s1 + $0x28] sm:$0xff] }
   0x3   :  { %v1385_v7 = vpack.c.bf16 %v18_v5, %v17_v2 }
   0x4   :  { %1383 = vmatpush3.bf16.msra.mxu0 %v1382_v4 }
   0x5   :  { %1384 = vmatprep.subr.bf16.mxu0 %v1560_v3 }
   0x6   :  { %8 = vsyncpa [#allocation3], 0  ;;  %v1388_v10 = vpack.c.bf16 %v20_v9, %v19_v8  ;;  %v21_v11 = vld [vmem:[%s2042_s1 + $0x30] sm:$0xff]  ;;  %v22_v12 = vld [vmem:[%s2042_s1 + $0x38] sm:$0xff]  ;;  %vm67_vm1 = vcmask 523264   ;;  %v63_v33 = vlaneseq  ;;  %vm238_vm2 = vcmask 261120  }
   0x7   :  { %v1391_v13 = vpack.c.bf16 %v22_v12, %v21_v11  ;;  %v1623_v14 = vld [vmem:[%s2041_s0] sm:$0xff]  ;;  %v1633_v15 = vld [vmem:[%s2041_s0 + $0x8] sm:$0xff]  ;;  %v1642_v16 = vld [vmem:[%s2041_s0 + $0x10] sm:$0xff]  ;;  %s1563_s15 = smov 96   ;;  %s1564_s16 = smov 32   ;;  %vm1147_vm8 = vcmask 0  }
   0x8   :  { %1386 = vmatpush3.bf16.msra.mxu0 %v1385_v7  ;;  %v1651_v17 = vld [vmem:[%s2041_s0 + $0x18] sm:$0xff]  ;;  %v1660_v18 = vld [vmem:[%s2041_s0 + $0x20] sm:$0xff]  ;;  %v1669_v19 = vld [vmem:[%s2041_s0 + $0x28] sm:$0xff]  ;;  %v1712_v34 = vshrl.u32 %v63_v33, 7 }
   0x9   :  { %1387 = vmatprep.subr.bf16.mxu0 %v1560_v3  ;;  %v1678_v20 = vld [vmem:[%s2041_s0 + $0x30] sm:$0xff]  ;;  %v23_v21 = vld [vmem:[%s2042_s1 + $0x40] sm:$0xff]  ;;  %v24_v22 = vld [vmem:[%s2042_s1 + $0x48] sm:$0xff] }
   0xa   :  { %v1394_v23 = vpack.c.bf16 %v24_v22, %v23_v21  ;;  %v25_v24 = vld [vmem:[%s2042_s1 + $0x50] sm:$0xff]  ;;  %v26_v25 = vld [vmem:[%s2042_s1 + $0x58] sm:$0xff]  ;;  %v27_v27 = vld [vmem:[%s2042_s1 + $0x60] sm:$0xff]  ;;  %v65_v35 = vsub.s32 0, %v1712_v34  ;;  %vm1049_vm3 = vcmp.lt.s32.totalorder %v1712_v34, 4 }
   0xb   :  { %v1397_v26 = vpack.c.bf16 %v26_v25, %v25_v24  ;;  %v28_v28 = vld [vmem:[%s2042_s1 + $0x68] sm:$0xff]  ;;  %v29_v30 = vld [vmem:[%s2042_s1 + $0x70] sm:$0xff]  ;;  %v30_v31 = vld [vmem:[%s2042_s1 + $0x78] sm:$0xff] }
   0xc   :  { %1389 = vmatpush3.bf16.msra.mxu0 %v1388_v10  ;;  %1395 = vmatpush3.bf16.msra.mxu1 %v1394_v23  ;;  %v1400_v29 = vpack.c.bf16 %v28_v28, %v27_v27  ;;  %v1403_v32 = vpack.c.bf16 %v30_v31, %v29_v30  ;;  %v1718_v36 = vld [vmem:[%s2043_s2] sm:$0xff]  ;;  %v40_v24 = vld [vmem:[%s2042_s1 + $0xc8] sm:$0xff]  ;;  %v41_v31 = vld [vmem:[%s2042_s1 + $0xd0] sm:$0xff] }
   0xd   :  { %1390 = vmatprep.subr.bf16.mxu0 %v1560_v3  ;;  %1396 = vmatprep.subr.bf16.mxu1 %v1560_v3  ;;  %v66_v37 = vrot.slane %v1718_v36, %v65_v35  ;;  %v39_v23 = vld [vmem:[%s2042_s1 + $0xc0] sm:$0xff] }
   0xe   :  { %v1406_v30 = vpack.c.bf16 %v40_v24, %v39_v23 }
  0x10   :  { %1392 = vmatpush3.bf16.msra.mxu0 %v1391_v13  ;;  %1398 = vmatpush3.bf16.msra.mxu1 %v1397_v26 }
  0x11   :  { %1419 = vmatprep.subr.bf16.mxu0 %v1560_v3  ;;  %1399 = vmatprep.subr.bf16.mxu1 %v1560_v3 }
  0x13   :  { %1261 = vmatmul.mubr.msk.f32.vlgmr.msra.gmra.mrb[0].mxu0 %vm67_vm1, %v1623_v14 }
  0x14   :  { %1263 = vmatprep.mubr.msk.f32.mxu0 %vm1561_vm0, %v1562_v6  ;;  %1401 = vmatpush3.bf16.msra.mxu1 %v1400_v29 }
  0x15   :  { %1402 = vmatprep.subr.bf16.mxu1 %v1560_v3 }
  0x17   :  { %1264 = vmatmul.mubr.msk.f32.gmra.mrb[2].mxu0 %vm67_vm1, %v1633_v15 }
  0x18   :  { %1266 = vmatprep.mubr.msk.f32.mxu0 %vm1561_vm0, %v1562_v6  ;;  %1404 = vmatpush3.bf16.msra.mxu1 %v1403_v32  ;;  %v42_v32 = vld [vmem:[%s2042_s1 + $0xd8] sm:$0xff] }
  0x19   :  { %1405 = vmatprep.subr.bf16.mxu1 %v1560_v3 }
  0x1b   :  { %1267 = vmatmul.mubr.msk.f32.gmra.mrb[4].mxu0 %vm67_vm1, %v1642_v16 }
  0x1c   :  { %1269 = vmatprep.mubr.msk.f32.mxu0 %vm1561_vm0, %v1562_v6 }
  0x1f   :  { %1270 = vmatmul.mubr.msk.f32.gmra.mrb[6].mxu0 %vm67_vm1, %v1651_v17 }
  0x20   :  { %1272 = vmatprep.mubr.msk.f32.mxu0 %vm1561_vm0, %v1562_v6 }
  0x23   :  { %1273 = vmatmul.mubr.msk.f32.gmra.mrb[8].mxu0 %vm67_vm1, %v1660_v18 }
  0x24   :  { %1275 = vmatprep.mubr.msk.f32.mxu0 %vm1561_vm0, %v1562_v6 }
  0x27   :  { %1276 = vmatmul.mubr.msk.f32.gmra.mrb[10].mxu0 %vm67_vm1, %v1669_v19 }
  0x28   :  { %1278 = vmatprep.mubr.msk.f32.mxu0 %vm1561_vm0, %v1562_v6 }
  0x2b   :  { %1279 = vmatmul.mubr.msk.f32.gmra.mrb[12].mxu0 %vm67_vm1, %v1678_v20 }
  0x2c   :  { %1348 = vmatprep.mubr.msk.f32.mxu0 %vm1561_vm0, %v1562_v6 }
  0xe6   :  { %v155_v38 = vpop.f32.mrb[0].mxu0 }
  0xe7   :  { %v156_v39 = vadd.f32 %v155_v38, %v66_v37  ;;  %v1262_v40 = vpop.f32.mrb[1].mxu0  ;;  %v44_v38 = vld [vmem:[%s2042_s1 + $0xe8] sm:$0xff] }
  0xe9   :  { %v189_v41 = vsub.f32 0.0, %v156_v39 }
  0xea   :  { %v160_v42 = vpop.f32.mrb[2].mxu0 }
  0xeb   :  { %v196_v43 = vmul.f32 1.442695, %v189_v41  ;;  %v161_v44 = vadd.f32 %v160_v42, %v66_v37  ;;  %v1265_v45 = vpop.f32.mrb[3].mxu0  ;;  %v1409_v42 = vpack.c.bf16 %v42_v32, %v41_v31 }
  0xed   :  { %1450 = vpow2.f32 %v196_v43  ;;  %v190_v46 = vsub.f32 0.0, %v161_v44 }
  0xee   :  { %v165_v47 = vpop.f32.mrb[4].mxu0 }
  0xef   :  { %v198_v48 = vmul.f32 1.442695, %v190_v46  ;;  %v166_v49 = vadd.f32 %v165_v47, %v66_v37  ;;  %v1268_v50 = vpop.f32.mrb[5].mxu0 }
  0xf1   :  { %1452 = vpow2.f32 %v198_v48  ;;  %v191_v51 = vsub.f32 0.0, %v166_v49 }
  0xf2   :  { %v170_v52 = vpop.f32.mrb[6].mxu0 }
  0xf3   :  { %v200_v53 = vmul.f32 1.442695, %v191_v51  ;;  %v171_v54 = vadd.f32 %v170_v52, %v66_v37  ;;  %v1271_v55 = vpop.f32.mrb[7].mxu0 }
  0xf5   :  { %1454 = vpow2.f32 %v200_v53  ;;  %v192_v56 = vsub.f32 0.0, %v171_v54 }
  0xf6   :  { %v175_v57 = vpop.f32.mrb[8].mxu0 }
  0xf7   :  { %v1451_v58 = vpop.eup %1450  ;;  %v202_v59 = vmul.f32 1.442695, %v192_v56  ;;  %v176_v60 = vadd.f32 %v175_v57, %v66_v37  ;;  %v1274_v61 = vpop.f32.mrb[9].mxu0 }
  0xf8   :  { %v210_v62 = vadd.f32 1.0, %v1451_v58 }
  0xf9   :  { %1456 = vpow2.f32 %v202_v59  ;;  %v193_v63 = vsub.f32 0.0, %v176_v60 }
  0xfa   :  { %1458 = vrcp.f32 %v210_v62  ;;  %v180_v0 = vpop.f32.mrb[10].mxu0 }
  0xfb   :  { %v1453_v1 = vpop.eup %1452  ;;  %v204_v2 = vmul.f32 1.442695, %v193_v63  ;;  %v181_v4 = vadd.f32 %v180_v0, %v66_v37  ;;  %v1277_v5 = vpop.f32.mrb[11].mxu0  ;;  %v45_v0 = vld [vmem:[%s2042_s1 + $0xf0] sm:$0xff] }
  0xfc   :  { %v211_v7 = vadd.f32 1.0, %v1453_v1  ;;  %v46_v1 = vld [vmem:[%s2042_s1 + $0xf8] sm:$0xff]  ;;  %v562_v5 = vld [vmem:[%s2041_s0 + $0x40] sm:$0xff] }
  0xfd   :  { %1460 = vpow2.f32 %v204_v2  ;;  %v194_v8 = vsub.f32 0.0, %v181_v4  ;;  %v1812_v2 = vld [vmem:[%s2041_s0 + $0x38] sm:$0xff]  ;;  %v1415_v4 = vpack.c.bf16 %v46_v1, %v45_v0 }
  0xfe   :  { %1462 = vrcp.f32 %v211_v7  ;;  %v185_v9 = vpop.f32.mrb[12].mxu0  ;;  %v563_v7 = vld [vmem:[%s2041_s0 + $0x48] sm:$0xff] }
  0xff   :  { %v1455_v10 = vpop.eup %1454  ;;  %v206_v11 = vmul.f32 1.442695, %v194_v8  ;;  %v186_v12 = vadd.f32 %v185_v9, %v66_v37  ;;  %v1280_v13 = vpop.f32.mrb[13].mxu0  ;;  %v43_v37 = vld [vmem:[%s2042_s1 + $0xe0] sm:$0xff]  ;;  %v48_v9 = vld [vmem:[%s2042_s1 + $0x108] sm:$0xff] }
 0x100   :  { %v212_v21 = vadd.f32 1.0, %v1455_v10  ;;  %v1411_v43 = vpack.c.bf16 %v44_v38, %v43_v37  ;;  %v47_v8 = vld [vmem:[%s2042_s1 + $0x100] sm:$0xff] }
 0x101   :  { %1464 = vpow2.f32 %v206_v11  ;;  %v195_v22 = vsub.f32 0.0, %v186_v12  ;;  %v1420_v10 = vpack.c.bf16 %v48_v9, %v47_v8  ;;  %v49_v11 = vld [vmem:[%s2042_s1 + $0x110] sm:$0xff]  ;;  %v50_v12 = vld [vmem:[%s2042_s1 + $0x118] sm:$0xff] }
 0x102   :  { %1466 = vrcp.f32 %v212_v21  ;;  %v1423_v13 = vpack.c.bf16 %v50_v12, %v49_v11  ;;  %v248_v21 = vsub.s32 1, %v1712_v34 }
 0x103   :  { %v1457_v25 = vpop.eup %1456  ;;  %v208_v26 = vmul.f32 1.442695, %v195_v22  ;;  %1421 = vmatpush3.bf16.msra.mxu0 %v1420_v10 }
 0x104   :  { %v1727_v27 = vpop.eup %1458  ;;  %v213_v28 = vadd.f32 1.0, %v1457_v25  ;;  %1422 = vmatprep.subr.bf16.mxu0 %v1560_v3  ;;  %v1843_v22 = vrot.slane %v1718_v36, %v248_v21  ;;  %v53_v21 = vld [vmem:[%s2042_s1 + $0x130] sm:$0xff] }
 0x105   :  { %1468 = vpow2.f32 %v208_v26  ;;  %v231_v29 = vmul.f32 %v1727_v27, %v1623_v14 }
 0x106   :  { %1470 = vrcp.f32 %v213_v28 }
 0x107   :  { %v1461_v33 = vpop.eup %1460  ;;  %v239_v35 = vsel %vm238_vm2, %v231_v29, %v1623_v14  ;;  %1424 = vmatpush3.bf16.msra.mxu0 %v1423_v13 }
 0x108   :  { %v1745_v39 = vpop.eup %1462  ;;  %v214_v40 = vadd.f32 1.0, %v1461_v33  ;;  %1298 = vmatmul.mubr.msk.f32.vlgmr.msra.gmra.mrb[0].mxu1 %vm67_vm1, %v239_v35  ;;  %1431 = vmatprep.subr.bf16.mxu0 %v1560_v3 }
 0x109   :  { %1407 = vmatpush3.bf16.msra.mxu1 %v1406_v30  ;;  %1300 = vmatprep.mubr.msk.f32.mxu1 %vm1561_vm0, %v1562_v6  ;;  %v232_v41 = vmul.f32 %v1745_v39, %v1633_v15 }
 0x10a   :  { %1472 = vrcp.f32 %v214_v40  ;;  %1408 = vmatprep.subr.bf16.mxu1 %v1560_v3 }
 0x10b   :  { %v1465_v44 = vpop.eup %1464  ;;  %v240_v45 = vsel %vm238_vm2, %v232_v41, %v1633_v15 }
 0x10c   :  { %v1755_v46 = vpop.eup %1466  ;;  %v215_v47 = vadd.f32 1.0, %v1465_v44  ;;  %1301 = vmatmul.mubr.msk.f32.gmra.mrb[2].mxu1 %vm67_vm1, %v240_v45 }
 0x10d   :  { %1303 = vmatprep.mubr.msk.f32.mxu1 %vm1561_vm0, %v1562_v6  ;;  %v233_v48 = vmul.f32 %v1755_v46, %v1642_v16  ;;  %1410 = vmatpush3.bf16.msra.mxu1 %v1409_v42 }
 0x10e   :  { %1474 = vrcp.f32 %v215_v47  ;;  %1412 = vmatprep.subr.bf16.mxu1 %v1411_v43 }
 0x10f   :  { %v1469_v49 = vpop.eup %1468  ;;  %v241_v50 = vsel %vm238_vm2, %v233_v48, %v1642_v16 }
 0x110   :  { %v1764_v51 = vpop.eup %1470  ;;  %v216_v52 = vadd.f32 1.0, %v1469_v49  ;;  %1304 = vmatmul.mubr.msk.f32.gmra.mrb[4].mxu1 %vm67_vm1, %v241_v50 }
 0x111   :  { %1306 = vmatprep.mubr.msk.f32.mxu1 %vm1561_vm0, %v1562_v6  ;;  %v234_v53 = vmul.f32 %v1764_v51, %v1651_v17 }
 0x112   :  { %1476 = vrcp.f32 %v216_v52 }
 0x113   :  { %v242_v54 = vsel %vm238_vm2, %v234_v53, %v1651_v17 }
 0x114   :  { %v1773_v55 = vpop.eup %1472  ;;  %1307 = vmatmul.mubr.msk.f32.gmra.mrb[6].mxu1 %vm67_vm1, %v242_v54 }
 0x115   :  { %1309 = vmatprep.mubr.msk.f32.mxu1 %vm1561_vm0, %v1562_v6  ;;  %v235_v56 = vmul.f32 %v1773_v55, %v1660_v18 }
 0x117   :  { %v243_v57 = vsel %vm238_vm2, %v235_v56, %v1660_v18 }
 0x118   :  { %v1782_v58 = vpop.eup %1474  ;;  %1310 = vmatmul.mubr.msk.f32.gmra.mrb[8].mxu1 %vm67_vm1, %v243_v57 }
 0x119   :  { %1312 = vmatprep.mubr.msk.f32.mxu1 %vm1561_vm0, %v1562_v6  ;;  %v236_v59 = vmul.f32 %v1782_v58, %v1669_v19 }
 0x11b   :  { %v244_v60 = vsel %vm238_vm2, %v236_v59, %v1669_v19  ;;  %v51_v59 = vld [vmem:[%s2042_s1 + $0x120] sm:$0xff] }
 0x11c   :  { %v1791_v61 = vpop.eup %1476  ;;  %1313 = vmatmul.mubr.msk.f32.gmra.mrb[10].mxu1 %vm67_vm1, %v244_v60  ;;  %v52_v60 = vld [vmem:[%s2042_s1 + $0x128] sm:$0xff] }
 0x11d   :  { %1315 = vmatprep.mubr.msk.f32.mxu1 %vm1561_vm0, %v1562_v6  ;;  %v237_v62 = vmul.f32 %v1791_v61, %v1678_v20 }
 0x11f   :  { %v245_v63 = vsel %vm238_vm2, %v237_v62, %v1678_v20  ;;  %v1426_v62 = vpack.c.bf16 %v52_v60, %v51_v59 }
 0x120   :  { %1316 = vmatmul.mubr.msk.f32.gmra.mrb[12].mxu1 %vm67_vm1, %v245_v63 }
 0x121   :  { %1326 = vmatprep.mubr.msk.f32.mxu1 %vm1561_vm0, %v1562_v6 }
 0x124   :  { %1327 = vmatmul.mubr.msk.f32.vlgmr.msra.gmra.mrb[14].mxu1 %vm238_vm2, %v1812_v2 }
 0x125   :  { %1414 = vmatpush3.bf16.msra.mxu1 %v1411_v43  ;;  %1337 = vmatprep.mubr.msk.f32.mxu1 %vm238_vm2, %v562_v5 }
 0x126   :  { %1416 = vmatprep.subr.bf16.mxu1 %v1415_v4 }
 0x129   :  { %1418 = vmatpush3.bf16.msra.mxu1 %v1415_v4 }
 0x12a   :  { %1425 = vmatprep.subr.bf16.mxu1 %v1560_v3 }
 0x12c   :  { %1338 = vmatmul.mubr.msk.f32.vlgmr.msra.gmra.mrb[16].mxu1 %vm238_vm2, %v563_v7 }
 0x12d   :  { %1359 = vmatprep.mubr.msk.f32.mxu1 %vm1561_vm0, %v1562_v6  ;;  %1427 = vmatpush3.bf16.msra.mxu1 %v1426_v62 }
 0x12e   :  { %1428 = vmatprep.subr.bf16.mxu1 %v1560_v3 }
 0x1db   :  { %v337_v23 = vpop.f32.mrb[0].mxu1 }
 0x1dc   :  { %v1846_v24 = vadd.f32 %v337_v23, %v1843_v22  ;;  %v1299_v25 = vpop.f32.mrb[1].mxu1  ;;  %v54_v23 = vld [vmem:[%s2042_s1 + $0x138] sm:$0xff] }
 0x1dd   :  { %v1429_v25 = vpack.c.bf16 %v54_v23, %v53_v21  ;;  %v31_v21 = vld [vmem:[%s2042_s1 + $0x80] sm:$0xff]  ;;  %v33_v23 = vld [vmem:[%s2042_s1 + $0x90] sm:$0xff] }
 0x1df   :  { %v1848_v26 = vpop.f32.mrb[2].mxu1  ;;  %1430 = vmatpush3.bf16.msra.mxu1 %v1429_v25  ;;  %v34_v25 = vld [vmem:[%s2042_s1 + $0x98] sm:$0xff] }
 0x1e0   :  { %v1302_v28 = vpop.f32.mrb[3].mxu1 }
 0x1e3   :  { %v347_v29 = vpop.f32.mrb[4].mxu1 }
 0x1e4   :  { %v1851_v30 = vadd.f32 %v347_v29, %v1843_v22  ;;  %v1305_v31 = vpop.f32.mrb[5].mxu1 }
 0x1e7   :  { %v352_v32 = vpop.f32.mrb[6].mxu1 }
 0x1e8   :  { %v1854_v33 = vadd.f32 %v352_v32, %v1843_v22  ;;  %v1308_v35 = vpop.f32.mrb[7].mxu1 }
 0x1eb   :  { %v357_v37 = vpop.f32.mrb[8].mxu1 }
 0x1ec   :  { %v1857_v38 = vadd.f32 %v357_v37, %v1843_v22  ;;  %v1311_v40 = vpop.f32.mrb[9].mxu1 }
 0x1ed   :  { %v744_v40 = vsub.s32 2, %v1712_v34 }
 0x1ef   :  { %v362_v41 = vpop.f32.mrb[10].mxu1 }
 0x1f0   :  { %v1860_v42 = vadd.f32 %v362_v41, %v1843_v22  ;;  %v1314_v43 = vpop.f32.mrb[11].mxu1  ;;  %v745_v41 = vrot.slane %v1718_v36, %v744_v40 }
 0x1f3   :  { %v367_v44 = vpop.f32.mrb[12].mxu1 }
 0x1f4   :  { %v1863_v45 = vadd.f32 %v367_v44, %v1843_v22  ;;  %v1317_v47 = vpop.f32.mrb[13].mxu1 }
 0x1f7   :  { %v633_v48 = vpop.f32.mrb[14].mxu1 }
 0x1f8   :  { %v1328_v49 = vpop.f32.mrb[15].mxu1  ;;  %1349 = vmatmul.mubr.msk.f32.vlgmr.msra.gmra.mrb[14].mxu0 %vm238_vm2, %v633_v48 }
 0x1f9   :  { %1378 = vmatprep.mubr.msk.f32.mxu0 %vm1561_vm0, %v1562_v6 }
 0x1ff   :  { %v1339_v50 = vpop.f32.mrb[16].mxu1 }
 0x200   :  { %v723_v52 = vmul.f32 %v1339_v50, %v633_v48  ;;  %v709_v53 = vpop.f32.mrb[17].mxu1 }
 0x201   :  { %v718_v54 = vmul.f32 %v709_v53, %v633_v48 }
 0x202   :  { %v724_v57 = vsel %vm238_vm2, %v723_v52, 0.0 }
 0x203   :  { %v719_v56 = vsel %vm238_vm2, %v718_v54, 0.0 }
 0x204   :  { %720 = vadd.xlane.f32.xlu0 %v719_v56 }
 0x208   :  { %725 = vadd.xlane.f32.xlu0 %v724_v57 }
 0x291   :  { %v721_v63 = vpop.xlane.xlu0 %720 }
 0x292   :  { %v722_v1 = vmul.f32 0.17677669, %v721_v63  ;;  %v835_v63 = vsub.s32 3, %v1712_v34 }
 0x295   :  { %v726_v0 = vpop.xlane.xlu0 %725 }
 0x296   :  { %v727_v4 = vmul.f32 0.17677669, %v726_v0  ;;  %v836_v0 = vrot.slane %v1718_v36, %v835_v63 }
 0x298   :  { %v728_v5 = vmax.f32 %v722_v1, %v727_v4 }
 0x29a   :  { %v729_v7 = vsub.f32 %v722_v1, %v728_v5  ;;  %v732_v8 = vsub.f32 %v727_v4, %v728_v5 }
 0x29c   :  { %v730_v9 = vmul.f32 1.442695, %v729_v7  ;;  %v733_v10 = vmul.f32 1.442695, %v732_v8  ;;  %v343_v8 = vadd.f32 %v1848_v26, %v1843_v22  ;;  %v32_v22 = vld [vmem:[%s2042_s1 + $0x88] sm:$0xff] }
 0x29d   :  { %v1432_v26 = vpack.c.bf16 %v32_v22, %v31_v21 }
 0x29e   :  { %1478 = vpow2.f32 %v730_v9 }
 0x29f   :  { %1480 = vpow2.f32 %v733_v10  ;;  %1433 = vmatpush3.bf16.msra.mxu0 %v1432_v26 }
 0x2a0   :  { %1434 = vmatprep.subr.bf16.mxu0 %v1560_v3 }
 0x2a8   :  { %v1479_v11 = vpop.eup %1478 }
 0x2a9   :  { %v1481_v12 = vpop.eup %1480 }
 0x2aa   :  { %v735_v13 = vadd.f32 %v1481_v12, %v1479_v11 }
 0x2ac   :  { %1482 = vrcp.f32 %v735_v13 }
 0x2b6   :  { %v1483_v28 = vpop.eup %1482 }
 0x2b7   :  { %v737_v29 = vmul.f32 %v1483_v28, %v1479_v11  ;;  %v739_v31 = vmul.f32 %v1483_v28, %v1481_v12  ;;  %v1435_v28 = vpack.c.bf16 %v34_v25, %v33_v23 }
 0x2b9   :  { %v738_v32 = vmul.f32 %v737_v29, %v709_v53  ;;  %v740_v35 = vmul.f32 %v1339_v50, %v739_v31  ;;  %1436 = vmatpush3.bf16.msra.mxu0 %v1435_v28  ;;  %v36_v29 = vld [vmem:[%s2042_s1 + $0xa8] sm:$0xff] }
 0x2ba   :  { %1437 = vmatprep.subr.bf16.mxu0 %v1560_v3 }
 0x2bb   :  { %v741_v37 = vadd.f32 %v740_v35, %v738_v32  ;;  %v37_v35 = vld [vmem:[%s2042_s1 + $0xb0] sm:$0xff] }
 0x2bd   :  { %826 = vrot.lane.b32.xlu1 %v741_v37, %s1563_s15  ;;  %v38_v37 = vld [vmem:[%s2042_s1 + $0xb8] sm:$0xff] }
 0x2be   :  { %v1441_v40 = vpack.c.bf16 %v38_v37, %v37_v35 }
 0x2cb   :  { %v815_v43 = vpop.f32.mrb[14].mxu0 }
 0x2cc   :  { %v816_v44 = vadd.f32 %v815_v43, %v745_v41  ;;  %v1350_v47 = vpop.f32.mrb[15].mxu0 }
 0x2ce   :  { %v819_v49 = vsub.f32 0.0, %v816_v44 }
 0x2d0   :  { %v820_v52 = vmul.f32 1.442695, %v819_v49 }
 0x2d2   :  { %1484 = vpow2.f32 %v820_v52  ;;  %v926_v52 = vsub.s32 4, %v1712_v34 }
 0x2dc   :  { %v1485_v54 = vpop.eup %1484 }
 0x2dd   :  { %v822_v56 = vadd.f32 1.0, %v1485_v54  ;;  %v379_v54 = vsub.f32 1.0, %v1745_v39 }
 0x2df   :  { %1486 = vrcp.f32 %v822_v56 }
 0x2e0   :  { %1488 = vtanh.f32 %v343_v8 }
 0x2e1   :  { %1490 = vtanh.f32 %v1846_v24  ;;  %v35_v24 = vld [vmem:[%s2042_s1 + $0xa0] sm:$0xff]  ;;  %s1565_s1 = smov 64  }
 0x2e2   :  { %v1438_v31 = vpack.c.bf16 %v36_v29, %v35_v24 }
 0x2e4   :  { %1439 = vmatpush3.bf16.msra.mxu0 %v1438_v31 }
 0x2e5   :  { %1440 = vmatprep.subr.bf16.mxu0 %v1560_v3  ;;  %v378_v3 = vsub.f32 1.0, %v1727_v27 }
 0x2e8   :  { %1442 = vmatpush3.bf16.msra.mxu0 %v1441_v40 }
 0x2e9   :  { %v1487_v57 = vpop.eup %1486 }
 0x2ea   :  { %v830_v53 = vsub.f32 1.0, %v1487_v57 }
 0x2ec   :  { %v831_v50 = vmul.f32 %v830_v53, %v633_v48  ;;  %v1489_v48 = vpop.eup %1488  ;;  %v931_v53 = vsub.s32 5, %v1712_v34 }
 0x2ed   :  { %v1491_v32 = vpop.eup %1490 }
 0x32f   :  { %v827_v59 = vpop.permute.xlu1 %826 }
 0x330   :  { %v829_v60 = vmul.f32 %v1487_v57, %v827_v59 }
 0x332   :  { %v832_v62 = vadd.f32 %v831_v50, %v829_v60 }
 0x334   :  { %1360 = vmatmul.mubr.msk.f32.vlgmr.msra.gmra.mrb[18].mxu1 %vm238_vm2, %v832_v62  ;;  %v927_v62 = vrot.slane %v1718_v36, %v926_v52  ;;  %v380_v52 = vsub.f32 1.0, %v1755_v46 }
 0x407   :  { %v906_v1 = vpop.f32.mrb[18].mxu1 }
 0x408   :  { %v907_v4 = vadd.f32 %v906_v1, %v836_v0  ;;  %v1361_v5 = vpop.f32.mrb[19].mxu1 }
 0x409   :  { %v932_v5 = vrot.slane %v1718_v36, %v931_v53 }
 0x40a   :  { %v910_v7 = vsel %vm238_vm2, %v907_v4, 0.0 }
 0x40b   :  { %911 = vadd.xlane.f32.xlu1 %v910_v7 }
 0x41c   :  { %422 = vrot.lane.b32.xlu1 %v1489_v48, %s1564_s16 }
 0x498   :  { %v912_v9 = vpop.xlane.xlu1 %911 }
 0x499   :  { %v914_v10 = vmul.f32 0.03125, %v912_v9 }
 0x49b   :  { %v915_v11 = vsub.f32 %v907_v4, %v914_v10 }
 0x49c   :  { %v423_v56 = vpop.permute.xlu1 %422 }
 0x49d   :  { %v916_v12 = vmul.f32 %v915_v11, %v915_v11  ;;  %v442_v0 = vmul.f32 %v1745_v39, %v423_v56  ;;  %v382_v56 = vsub.f32 1.0, %v1773_v55 }
 0x49f   :  { %v917_v13 = vsel %vm238_vm2, %v916_v12, 0.0 }
 0x4a0   :  { %918 = vadd.xlane.f32.xlu0 %v917_v13 }
 0x4b6   :  { %385 = vrot.lane.b32.xlu0 %v1623_v14, %s1564_s16 }
 0x4ba   :  { %387 = vrot.lane.b32.xlu0 %v1633_v15, %s1564_s16 }
 0x4be   :  { %420 = vrot.lane.b32.xlu0 %v1491_v32, %s1564_s16 }
 0x52d   :  { %v919_v41 = vpop.xlane.xlu0 %918 }
 0x52e   :  { %v920_v43 = vmul.f32 0.03125, %v919_v41 }
 0x530   :  { %v921_v44 = vadd.f32 1e-05, %v920_v43 }
 0x531   :  { %v386_v47 = vpop.permute.xlu0 %385 }
 0x532   :  { %1492 = vrsqrt.f32 %v921_v44  ;;  %v406_v50 = vmul.f32 %v386_v47, %v378_v3  ;;  %v381_v44 = vsub.f32 1.0, %v1764_v51 }
 0x533   :  { %1494 = vtanh.f32 %v1851_v30 }
 0x534   :  { %1496 = vtanh.f32 %v1854_v33 }
 0x535   :  { %v388_v49 = vpop.permute.xlu0 %387  ;;  %1498 = vtanh.f32 %v1857_v38 }
 0x536   :  { %v407_v59 = vmul.f32 %v388_v49, %v379_v54  ;;  %1500 = vtanh.f32 %v1860_v42  ;;  %v937_v49 = vsub.s32 6, %v1712_v34 }
 0x537   :  { %1502 = vtanh.f32 %v1863_v45 }
 0x538   :  { %v449_v7 = vadd.f32 %v442_v0, %v407_v59 }
 0x539   :  { %v421_v57 = vpop.permute.xlu0 %420 }
 0x53a   :  { %v441_v60 = vmul.f32 %v1727_v27, %v421_v57  ;;  %v456_v10 = vmul.f32 %v449_v7, %v1633_v15 }
 0x53c   :  { %v1493_v63 = vpop.eup %1492  ;;  %v448_v1 = vadd.f32 %v441_v60, %v406_v50 }
 0x53d   :  { %v923_v4 = vmul.f32 %v1493_v63, %v915_v11  ;;  %v1495_v21 = vpop.eup %1494  ;;  %v938_v63 = vrot.slane %v1718_v36, %v937_v49 }
 0x53e   :  { %v455_v8 = vmul.f32 %v448_v1, %v1623_v14  ;;  %v1497_v22 = vpop.eup %1496 }
 0x53f   :  { %v928_v48 = vmul.f32 %v927_v62, %v923_v4  ;;  %v1499_v30 = vpop.eup %1498  ;;  %v384_v4 = vsub.f32 1.0, %v1791_v61 }
 0x540   :  { %459 = vrot.lane.b32.xlu0 %v455_v8, %s1563_s15  ;;  %v1501_v33 = vpop.eup %1500 }
 0x541   :  { %v1937_v9 = vadd.f32 %v932_v5, %v928_v48  ;;  %v1503_v38 = vpop.eup %1502 }
 0x543   :  { %v934_v27 = vsel %vm238_vm2, %v1937_v9, %v1812_v2 }
 0x544   :  { %1379 = vmatmul.mubr.msk.f32.vlgmr.msra.gmra.mrb[16].mxu0 %vm67_vm1, %v934_v27  ;;  %461 = vrot.lane.b32.xlu0 %v456_v10, %s1563_s15 }
 0x5b2   :  { %v460_v39 = vpop.permute.xlu0 %459 }
 0x5b3   :  { %v465_v11 = vsel %vm238_vm2, %v460_v39, 0.0 }
 0x5b4   :  { %466 = vadd.xlane.f32.xlu0 %v465_v11 }
 0x5b6   :  { %v462_v12 = vpop.permute.xlu0 %461 }
 0x5b7   :  { %v468_v13 = vsel %vm238_vm2, %v462_v12, 0.0 }
 0x5b8   :  { %469 = vadd.xlane.f32.xlu1 %v468_v13 }
 0x5c9   :  { %391 = vrot.lane.b32.xlu1 %v1651_v17, %s1564_s16 }
 0x5ca   :  { %389 = vrot.lane.b32.xlu0 %v1642_v16, %s1564_s16 }
 0x5cd   :  { %393 = vrot.lane.b32.xlu1 %v1660_v18, %s1564_s16 }
 0x5ce   :  { %424 = vrot.lane.b32.xlu0 %v1495_v21, %s1564_s16 }
 0x5d1   :  { %395 = vrot.lane.b32.xlu1 %v1669_v19, %s1564_s16 }
 0x5d2   :  { %426 = vrot.lane.b32.xlu0 %v1497_v22, %s1564_s16 }
 0x5d5   :  { %537 = vrot.lane.b32.xlu1 %v1642_v16, %s1565_s1 }
 0x5d6   :  { %428 = vrot.lane.b32.xlu0 %v1499_v30, %s1564_s16 }
 0x5d9   :  { %397 = vrot.lane.b32.xlu1 %v1678_v20, %s1564_s16 }
 0x5da   :  { %430 = vrot.lane.b32.xlu0 %v1501_v33, %s1564_s16 }
 0x5dd   :  { %541 = vrot.lane.b32.xlu1 %v1660_v18, %s1565_s1 }
 0x5de   :  { %539 = vrot.lane.b32.xlu0 %v1651_v17, %s1565_s1 }
 0x5e1   :  { %545 = vrot.lane.b32.xlu1 %v1678_v20, %s1565_s1 }
 0x5e2   :  { %432 = vrot.lane.b32.xlu0 %v1503_v38, %s1564_s16 }
 0x5e5   :  { %507 = vrot.lane.b32.xlu1 %v1623_v14, %s1563_s15 }
 0x5e6   :  { %543 = vrot.lane.b32.xlu0 %v1669_v19, %s1565_s1 }
 0x5e9   :  { %1025 = vrot.lane.b32.xlu1 %v1812_v2, %s1565_s1 }
 0x5ea   :  { %1020 = vrot.lane.b32.xlu0 %v1812_v2, %s1563_s15 }
 0x5ee   :  { %509 = vrot.lane.b32.xlu0 %v1633_v15, %s1563_s15 }
 0x5f2   :  { %1032 = vrot.lane.b32.xlu0 %v1812_v2, %s1564_s16 }
 0x617   :  { %v1008_v16 = vpop.f32.mrb[16].mxu0 }
 0x618   :  { %v1380_v17 = vpop.f32.mrb[17].mxu0  ;;  %v1009_v36 = vadd.f32 %v1008_v16, %v938_v63 }
 0x641   :  { %v467_v18 = vpop.xlane.xlu0 %466 }
 0x642   :  { %v471_v20 = vsub.f32 0.0, %v467_v18 }
 0x644   :  { %v473_v42 = vmul.f32 1.442695, %v471_v20 }
 0x645   :  { %v470_v45 = vpop.xlane.xlu1 %469  ;;  %v390_v26 = vpop.permute.xlu0 %389 }
 0x646   :  { %1504 = vpow2.f32 %v473_v42  ;;  %v472_v19 = vsub.f32 0.0, %v470_v45  ;;  %v408_v53 = vmul.f32 %v390_v26, %v380_v52  ;;  %v1012_v45 = vsub.f32 0.0, %v1009_v36 }
 0x648   :  { %v475_v23 = vmul.f32 1.442695, %v472_v19  ;;  %v1013_v16 = vmul.f32 1.442695, %v1012_v45 }
 0x649   :  { %v392_v25 = vpop.permute.xlu1 %391  ;;  %v425_v28 = vpop.permute.xlu0 %424 }
 0x64a   :  { %1506 = vpow2.f32 %v475_v23  ;;  %v443_v3 = vmul.f32 %v1755_v46, %v425_v28  ;;  %v409_v54 = vmul.f32 %v392_v25, %v381_v44  ;;  %v494_v44 = vsub.f32 1.0, %v1633_v15 }
 0x64c   :  { %v450_v0 = vadd.f32 %v443_v3, %v408_v53 }
 0x64d   :  { %v394_v24 = vpop.permute.xlu1 %393  ;;  %v427_v29 = vpop.permute.xlu0 %426 }
 0x64e   :  { %v444_v47 = vmul.f32 %v1764_v51, %v427_v29  ;;  %v410_v60 = vmul.f32 %v394_v24, %v382_v56  ;;  %v383_v51 = vsub.f32 1.0, %v1782_v58 }
 0x650   :  { %v1505_v31 = vpop.eup %1504  ;;  %v451_v62 = vadd.f32 %v444_v47, %v409_v54 }
 0x651   :  { %v477_v32 = vadd.f32 1.0, %v1505_v31  ;;  %v396_v35 = vpop.permute.xlu1 %395  ;;  %v429_v37 = vpop.permute.xlu0 %428  ;;  %v493_v31 = vsub.f32 1.0, %v1623_v14 }
 0x652   :  { %v445_v57 = vmul.f32 %v1773_v55, %v429_v37  ;;  %v411_v8 = vmul.f32 %v396_v35, %v383_v51 }
 0x653   :  { %1508 = vrcp.f32 %v477_v32 }
 0x654   :  { %v1507_v2 = vpop.eup %1506  ;;  %v452_v5 = vadd.f32 %v445_v57, %v410_v60 }
 0x655   :  { %v478_v40 = vadd.f32 1.0, %v1507_v2  ;;  %v538_v41 = vpop.permute.xlu1 %537  ;;  %v431_v43 = vpop.permute.xlu0 %430 }
 0x656   :  { %v446_v1 = vmul.f32 %v1782_v58, %v431_v43  ;;  %v552_v48 = vmul.f32 %v538_v41, %v450_v0 }
 0x657   :  { %1510 = vrcp.f32 %v478_v40 }
 0x658   :  { %v453_v30 = vadd.f32 %v446_v1, %v411_v8 }
 0x659   :  { %v398_v50 = vpop.permute.xlu1 %397  ;;  %v540_v59 = vpop.permute.xlu0 %539 }
 0x65a   :  { %v553_v46 = vmul.f32 %v540_v59, %v451_v62  ;;  %v412_v39 = vmul.f32 %v398_v50, %v384_v4 }
 0x65c   :  { %v557_v21 = vadd.f32 %v553_v46, %v552_v48 }
 0x65d   :  { %v1509_v7 = vpop.eup %1508  ;;  %v542_v55 = vpop.permute.xlu1 %541 }
 0x65e   :  { %v433_v10 = vpop.permute.xlu0 %432  ;;  %v483_v27 = vmax.f32 %v1509_v7, 1e-07  ;;  %v554_v11 = vmul.f32 %v542_v55, %v452_v5  ;;  %v1091_v55 = vld [vmem:[%s2041_s0 + $0x50] sm:$0xff] }
 0x65f   :  { %v447_v12 = vmul.f32 %v1791_v61, %v433_v10 }
 0x660   :  { %v485_v13 = vmin.f32 %v483_v27, 0.9999999  ;;  %v558_v20 = vadd.f32 %v557_v21, %v554_v11  ;;  %v1096_v27 = vmul.f32 %v1091_v55, %v1091_v55  ;;  %v1093_v11 = vld [vmem:[%s2041_s0 + $0x60] sm:$0xff]  ;;  %v1094_v21 = vld [vmem:[%s2041_s0 + $0x68] sm:$0xff] }
 0x661   :  { %v454_v22 = vadd.f32 %v447_v12, %v412_v39  ;;  %v1511_v58 = vpop.eup %1510  ;;  %v546_v33 = vpop.permute.xlu1 %545 }
 0x662   :  { %v544_v38 = vpop.permute.xlu0 %543  ;;  %v495_v17 = vsub.f32 1.0, %v485_v13  ;;  %v484_v18 = vmax.f32 %v1511_v58, 1e-07  ;;  %1512 = vlog2.f32 %v485_v13  ;;  %v1116_v13 = vmul.f32 %v1093_v11, %v1093_v11 }
 0x663   :  { %v555_v42 = vmul.f32 %v544_v38, %v453_v30  ;;  %v556_v19 = vmul.f32 %v546_v33, %v454_v22  ;;  %v1117_v22 = vmul.f32 %v1094_v21, %v1094_v21  ;;  %v1092_v30 = vld [vmem:[%s2041_s0 + $0x58] sm:$0xff] }
 0x664   :  { %v486_v26 = vmin.f32 %v484_v18, 0.9999999  ;;  %1514 = vlog2.f32 %v495_v17  ;;  %v1097_v58 = vmul.f32 %v1092_v30, %v1092_v30 }
 0x665   :  { %v559_v23 = vadd.f32 %v558_v20, %v555_v42  ;;  %v508_v53 = vpop.permute.xlu1 %507 }
 0x666   :  { %v496_v25 = vsub.f32 1.0, %v486_v26  ;;  %1516 = vlog2.f32 %v486_v26  ;;  %v1021_v28 = vpop.permute.xlu0 %1020 }
 0x667   :  { %v560_v61 = vadd.f32 %v559_v23, %v556_v19 }
 0x668   :  { %1518 = vlog2.f32 %v496_v25 }
 0x669   :  { %v1039_v24 = vmul.f32 %v1021_v28, %v560_v61  ;;  %1520 = vpow2.f32 %v1013_v16 }
 0x66b   :  { %1041 = vrot.lane.b32.xlu1 %v1039_v24, %s1563_s15 }
 0x66c   :  { %v1513_v29 = vpop.eup %1512 }
 0x66d   :  { %v488_v35 = vmul.f32 0.6931472, %v1513_v29 }
 0x66e   :  { %v1515_v32 = vpop.eup %1514 }
 0x66f   :  { %v498_v37 = vmul.f32 0.6931472, %v1515_v32  ;;  %v491_v40 = vmul.f32 %v488_v35, %v1623_v14  ;;  %v510_v14 = vpop.permute.xlu0 %509 }
 0x670   :  { %v1517_v2 = vpop.eup %1516 }
 0x671   :  { %v501_v41 = vmul.f32 %v498_v37, %v493_v31  ;;  %v490_v43 = vmul.f32 0.6931472, %v1517_v2 }
 0x672   :  { %v1519_v47 = vpop.eup %1518 }
 0x673   :  { %v503_v49 = vadd.f32 %v501_v41, %v491_v40  ;;  %v500_v52 = vmul.f32 0.6931472, %v1519_v47  ;;  %v1521_v3 = vpop.eup %1520  ;;  %v492_v56 = vmul.f32 %v490_v43, %v1633_v15  ;;  %v1026_v15 = vpop.permute.xlu1 %1025 }
 0x674   :  { %v1015_v60 = vadd.f32 1.0, %v1521_v3  ;;  %v1033_v8 = vpop.permute.xlu0 %1032 }
 0x675   :  { %v505_v54 = vsub.f32 0.0, %v503_v49  ;;  %v502_v57 = vmul.f32 %v500_v52, %v494_v44 }
 0x676   :  { %1522 = vrcp.f32 %v1015_v60 }
 0x677   :  { %v513_v50 = vmul.f32 %v508_v53, %v505_v54  ;;  %v504_v59 = vadd.f32 %v502_v57, %v492_v56 }
 0x679   :  { %v506_v62 = vsub.f32 0.0, %v504_v59  ;;  %517 = vrot.lane.b32.xlu0 %v513_v50, %s1565_s1 }
 0x67b   :  { %v514_v63 = vmul.f32 %v510_v14, %v506_v62 }
 0x67d   :  { %519 = vrot.lane.b32.xlu1 %v514_v63, %s1565_s1 }
 0x680   :  { %v1523_v51 = vpop.eup %1522 }
 0x681   :  { %v1019_v0 = vsub.f32 1.0, %v1523_v51  ;;  %v1018_v4 = vmul.f32 %v1523_v51, %v1937_v9  ;;  %v1095_v9 = vld [vmem:[%s2041_s0 + $0x70] sm:$0xff]  ;;  %v1183_v51 = vsel %vm1049_vm3, 1.0, %v1562_v6  ;;  %s1566_s0 = smov [#allocation2]  }
 0x682   :  { %v1118_v39 = vmul.f32 %v1095_v9, %v1095_v9  ;;  %s1155_s15 = sshll.u32 %s1566_s0, 4  ;;  %s1156_s15 = int_to_ptr.vmem [resolvable:$true] %s1155_s15 }
 0x683   :  { %v1023_v1 = vmul.f32 %v1021_v28, %v1019_v0  ;;  %s1536_s16 = scalar_lea.vmem %s1156_s15, 16  ;;  %s1540_s17 = scalar_lea.vmem %s1156_s15, 32 }
 0x684   :  { %p1537_p0 = scmp.ne.s32.totalorder %s1156_s15, %s1536_s16  ;;  %p1541_p1 = scmp.lt.s32.totalorder %s1156_s15, %s1156_s15 }
 0x685   :  { %v1024_v46 = vadd.f32 %v1023_v1, %v1018_v4  ;;  %p1542_p2 = scmp.lt.s32.totalorder %s1540_s17, %s1536_s16 }
 0x687   :  { %v1028_v5 = vmul.f32 %v1026_v15, %v1024_v46  ;;  %v1035_v48 = vmul.f32 %v1033_v8, %v1024_v46  ;;  %p1543_p3 = por %p1542_p2, %p1541_p1 }
 0x689   :  { %v1029_v7 = vsel %vm238_vm2, %v1028_v5, 0.0  ;;  %v1036_v10 = vsel %vm238_vm2, %v1035_v48, 0.0  ;;  %p1544_p4 = pnand %p1543_p3, %p1537_p0 }
 0x698   :  { %1030 = vadd.xlane.f32.xlu0 %v1029_v7 }
 0x6a1   :  { %1037 = vadd.xlane.f32.xlu1 %v1036_v10 }
 0x6a5   :  { %1098 = vadd.xlane.f32.xlu1 %v1096_v27 }
 0x6a9   :  { %1123 = vadd.xlane.f32.xlu1 %v1118_v39 }
 0x6dd   :  { %v1042_v12 = vpop.permute.xlu1 %1041 }
 0x6de   :  { %v1044_v36 = vsel %vm238_vm2, %v1042_v12, 0.0 }
 0x6df   :  { %1045 = vadd.xlane.f32.xlu0 %v1044_v36 }
 0x6e3   :  { %1119 = vadd.xlane.f32.xlu0 %v1116_v13 }
 0x6e7   :  { %1121 = vadd.xlane.f32.xlu0 %v1117_v22 }
 0x6eb   :  { %1100 = vadd.xlane.f32.xlu0 %v1097_v58  ;;  %v518_v33 = vpop.permute.xlu0 %517 }
 0x6ec   :  { %v523_v38 = vsel %vm238_vm2, %v518_v33, 0.0 }
 0x6ef   :  { %524 = vadd.xlane.f32.xlu0 %v523_v38  ;;  %v520_v17 = vpop.permute.xlu1 %519 }
 0x6f0   :  { %v526_v18 = vsel %vm238_vm2, %v520_v17, 0.0 }
 0x6f1   :  { %527 = vadd.xlane.f32.xlu1 %v526_v18 }
 0x725   :  { %v1031_v42 = vpop.xlane.xlu0 %1030 }
 0x72e   :  { %v1038_v20 = vpop.xlane.xlu1 %1037 }
 0x72f   :  { %v1052_v45 = vsub.f32 %v1031_v42, %v1038_v20 }
 0x731   :  { %v1054_v26 = vand.u32 2147483647, %v1052_v45  ;;  %v1053_v50 = vmin.f32 %v1052_v45, 0.0 }
 0x732   :  { %v1099_v24 = vpop.xlane.xlu1 %1098 }
 0x733   :  { %v1055_v19 = vsub.f32 0.0, %v1054_v26 }
 0x735   :  { %v1056_v23 = vmul.f32 1.442695, %v1055_v19 }
 0x736   :  { %v1124_v2 = vpop.xlane.xlu1 %1123 }
 0x737   :  { %1524 = vpow2.f32 %v1056_v23 }
 0x741   :  { %v1525_v25 = vpop.eup %1524 }
 0x742   :  { %v1058_v61 = vadd.f32 1.0, %v1525_v25 }
 0x744   :  { %1526 = vlog2.f32 %v1058_v61 }
 0x74e   :  { %v1527_v49 = vpop.eup %1526 }
 0x74f   :  { %v1060_v54 = vmul.f32 0.6931472, %v1527_v49 }
 0x751   :  { %v1061_v14 = vsub.f32 %v1053_v50, %v1060_v54 }
 0x753   :  { %v1062_v15 = vmul.f32 %v1183_v51, %v1061_v14 }
 0x755   :  { %v1064_v48 = vrot.slane %v1062_v15, 4 }
 0x757   :  { %v1065_v10 = vadd.f32 %v1064_v48, %v1062_v15 }
 0x759   :  { %v1066_v6 = vrot.slane %v1065_v10, 2 }
 0x75b   :  { %v1067_v30 = vadd.f32 %v1066_v6, %v1065_v10 }
 0x75d   :  { %v1068_v20 = vrot.slane %v1067_v30, 1 }
 0x76c   :  { %v1046_v16 = vpop.xlane.xlu0 %1045 }
 0x76d   :  { %v1070_v28 = vsub.f32 %v1031_v42, %v1046_v16 }
 0x76f   :  { %v1072_v29 = vand.u32 2147483647, %v1070_v28  ;;  %v1071_v27 = vmin.f32 %v1070_v28, 0.0 }
 0x770   :  { %v1120_v31 = vpop.xlane.xlu0 %1119 }
 0x771   :  { %v1073_v32 = vsub.f32 0.0, %v1072_v29 }
 0x773   :  { %v1074_v35 = vmul.f32 1.442695, %v1073_v32 }
 0x774   :  { %v1122_v37 = vpop.xlane.xlu0 %1121 }
 0x775   :  { %1528 = vpow2.f32 %v1074_v35  ;;  %v1125_v40 = vadd.f32 %v1122_v37, %v1120_v31 }
 0x777   :  { %v1126_v41 = vadd.f32 %v1125_v40, %v1124_v2 }
 0x778   :  { %v1101_v43 = vpop.xlane.xlu0 %1100 }
 0x779   :  { %v1127_v44 = vrot.slane %v1126_v41, 4  ;;  %v1102_v47 = vadd.f32 %v1101_v43, %v1099_v24  ;;  %v1069_v24 = vadd.f32 %v1068_v20, %v1067_v30 }
 0x77b   :  { %v1128_v52 = vadd.f32 %v1127_v44, %v1126_v41  ;;  %v1103_v3 = vrot.slane %v1102_v47, 4 }
 0x77c   :  { %v525_v46 = vpop.xlane.xlu0 %524 }
 0x77d   :  { %v1129_v56 = vrot.slane %v1128_v52, 2  ;;  %v1104_v57 = vadd.f32 %v1103_v3, %v1102_v47 }
 0x77e   :  { %v528_v1 = vpop.xlane.xlu1 %527 }
 0x77f   :  { %v1529_v53 = vpop.eup %1528  ;;  %v1130_v59 = vadd.f32 %v1129_v56, %v1128_v52  ;;  %v1105_v60 = vrot.slane %v1104_v57, 2  ;;  %v529_v7 = vadd.f32 %v528_v1, %v525_v46 }
 0x780   :  { %v1076_v62 = vadd.f32 1.0, %v1529_v53 }
 0x781   :  { %v1106_v63 = vadd.f32 %v1105_v60, %v1104_v57  ;;  %v1131_v0 = vrot.slane %v1130_v59, 1  ;;  %v530_v34 = vrot.slane %v529_v7, 4 }
 0x782   :  { %1530 = vlog2.f32 %v1076_v62 }
 0x783   :  { %v1107_v4 = vrot.slane %v1106_v63, 1  ;;  %v1132_v8 = vadd.f32 %v1131_v0, %v1130_v59  ;;  %v531_v39 = vadd.f32 %v530_v34, %v529_v7 }
 0x785   :  { %v1108_v5 = vadd.f32 %v1107_v4, %v1106_v63  ;;  %v532_v36 = vrot.slane %v531_v39, 2  ;;  %vm1135_vm5 = vcmp.eq.f32.partialorder %v1132_v8, inf  ;;  %v1138_v16 = vand.u32 2147483648, %v1132_v8 }
 0x786   :  { %vm1137_vm7 = vcmp.eq.f32.partialorder %v1132_v8, 0.0 }
 0x787   :  { %1532 = vrsqrt.f32 %v1108_v5  ;;  %v533_v33 = vadd.f32 %v532_v36, %v531_v39  ;;  %vm1111_vm4 = vcmp.eq.f32.partialorder %v1108_v5, inf  ;;  %v1114_v19 = vand.u32 2147483648, %v1108_v5 }
 0x788   :  { %1534 = vrsqrt.f32 %v1132_v8  ;;  %vm1113_vm6 = vcmp.eq.f32.partialorder %v1108_v5, 0.0 }
 0x789   :  { %v534_v45 = vrot.slane %v533_v33, 1 }
 0x78b   :  { %v535_v28 = vadd.f32 %v534_v45, %v533_v33 }
 0x78c   :  { %v1531_v55 = vpop.eup %1530 }
 0x78d   :  { %v1078_v9 = vmul.f32 0.6931472, %v1531_v55  ;;  %v536_v37 = vmul.f32 0.0026041667, %v535_v28 }
 0x78f   :  { %v1079_v11 = vsub.f32 %v1071_v27, %v1078_v9  ;;  %v1142_v43 = vmul.f32 0.5, %v536_v37 }
 0x791   :  { %v1080_v12 = vmul.f32 %v1183_v51, %v1079_v11  ;;  %v1533_v13 = vpop.eup %1532 }
 0x792   :  { %v1535_v22 = vpop.eup %1534  ;;  %v1110_v38 = vmul.f32 %v1533_v13, %v1108_v5 }
 0x793   :  { %v1082_v21 = vrot.slane %v1080_v12, 4  ;;  %v1134_v18 = vmul.f32 %v1535_v22, %v1132_v8 }
 0x794   :  { %v1112_v26 = vsel %vm1111_vm4, %v1108_v5, %v1110_v38 }
 0x795   :  { %v1083_v58 = vadd.f32 %v1082_v21, %v1080_v12  ;;  %v1136_v25 = vsel %vm1135_vm5, %v1132_v8, %v1134_v18  ;;  %v1115_v61 = vsel %vm1113_vm6, %v1114_v19, %v1112_v26 }
 0x796   :  { %v1139_v31 = vsel %vm1137_vm7, %v1138_v16, %v1136_v25 }
 0x797   :  { %v1084_v17 = vrot.slane %v1083_v58, 2  ;;  %v1140_v35 = vadd.f32 %v1139_v31, %v1115_v61 }
 0x799   :  { %v1085_v42 = vadd.f32 %v1084_v17, %v1083_v58  ;;  %v1141_v41 = vmul.f32 0.05882353, %v1140_v35 }
 0x79b   :  { %v1086_v23 = vrot.slane %v1085_v42, 1  ;;  %v1145_v49 = vmul.f32 0.001, %v1141_v41 }
 0x79d   :  { %v1087_v29 = vadd.f32 %v1086_v23, %v1085_v42 }
 0x79f   :  { %v1088_v32 = vadd.f32 %v1087_v29, %v1069_v24 }
 0x7a1   :  { %v1089_v2 = vsub.f32 0.0, %v1088_v32 }
 0x7a3   :  { %v1090_v40 = vmul.f32 0.25, %v1089_v2 }
 0x7a5   :  { %v1143_v44 = vmul.f32 0.5, %v1090_v40 }
 0x7a7   :  { %v1144_v47 = vadd.f32 %v1143_v44, %v1142_v43 }
 0x7a9   :  { %v1146_v52 = vadd.f32 %v1145_v49, %v1144_v47 }
 0x7ab   :  { %1148 = vst.msk [vmem:[#allocation2] sm:$0x1] %vm1147_vm8, %v1146_v52 }
 0x7ac   :  { %1547 = shalt.err (!%p1544_p4)
}
 0x7ad   :  { %s1548_s20 = scalar_lea.hbm %s2044_s3, 16 }
 0x7ae   :  { %p1549_p5 = scmp.ne.s32.totalorder %s2044_s3, %s1548_s20  ;;  %p1552_p6 = scmp.lt.u32.totalorder %s1548_s20, %s2044_s3 }
 0x7b0   :  { %p1554_p7 = pnand %p1552_p6, %p1549_p5 }
 0x7b2   :  { %1557 = shalt.err (!%p1554_p7)
}
 0x7b3   :  { %1158 = dma.vmem_to_hbm [thread:$0]  %s1156_s15, 16, %s2044_s3, [#allocation3]  }
 0x7b4   :  { %1558 = dma.done.wait [#allocation3], 16  }
 0x7b5   :  { %1559 = vsyncadd [#allocation3], 4294967280 }
 0x7b6   :  { %1162 = vsyncpa [#allocation3], 1 }

</bundles_post_ra>
